<compile_context>
chip_gen: v5e
topology: v5e:2x2
jax: 0.10.0
libtpu: 0.0.40
codegen_flags: <defaults>
</compile_context>

<pallas_src>
import functools

import jax
import jax.numpy as jnp
from jax.experimental import pallas as pl
from jax.experimental.pallas import tpu as pltpu

INPUT_SIZE = 784
HIDDEN_SIZE = 500
NUM_CLASSES = 10

# Lane-aligned (multiple-of-128) padded sizes used inside the kernel.
HIDDEN_PAD = 512
OUT_PAD = 128


def _round_up(x, m):
    return ((x + m - 1) // m) * m


def mlp_kernel(x_ref, w1_ref, b1_ref, w2_ref, b2_ref, out_ref):
    # Cast x to bf16 in-kernel (no-op if already bf16) so the only HBM pass
    # over x is the tile DMA itself.
    x = x_ref[...].astype(jnp.bfloat16)
    # fc1: (TM, 784) bf16 @ (784, 512) bf16 -> f32 accumulate on the MXU.
    h = jnp.dot(x, w1_ref[...], preferred_element_type=jnp.float32)
    # Bias add + ReLU in f32 on the VPU (safe on v5e: no bf16 VPU math needed).
    h = jnp.maximum(h + b1_ref[...], 0.0)
    # fc2: (TM, 512) bf16 @ (512, 128) bf16 -> f32 accumulate.
    out = jnp.dot(h.astype(jnp.bfloat16), w2_ref[...],
                  preferred_element_type=jnp.float32)
    # bf16 writeback halves output HBM traffic; columns 10..127 are sliced off.
    out_ref[...] = (out + b2_ref[...]).astype(out_ref.dtype)


def prepare_params(w1, b1, w2, b2):
    """Zero-pad params to lane-aligned shapes and cast weights to bf16.

    In:  w1 (784, 500) f32, b1 (1, 500) f32, w2 (500, 10) f32, b2 (1, 10) f32
    Out: w1 (784, 512) bf16, b1 (1, 512) f32, w2 (512, 128) bf16, b2 (1, 128) f32
    Padding keeps the math identical: padded hidden units have zero weights and
    zero bias (so zero after ReLU), padded output columns are sliced off.
    """
    w1p = jnp.pad(w1, ((0, 0), (0, HIDDEN_PAD - HIDDEN_SIZE))).astype(jnp.bfloat16)
    b1p = jnp.pad(b1, ((0, 0), (0, HIDDEN_PAD - HIDDEN_SIZE))).astype(jnp.float32)
    w2p = jnp.pad(w2, ((0, HIDDEN_PAD - HIDDEN_SIZE),
                       (0, OUT_PAD - NUM_CLASSES))).astype(jnp.bfloat16)
    b2p = jnp.pad(b2, ((0, 0), (0, OUT_PAD - NUM_CLASSES))).astype(jnp.float32)
    return w1p, b1p, w2p, b2p


@functools.partial(jax.jit, static_argnames=("tm",))
def mlp_forward(x, w1p, b1p, w2p, b2p, *, tm=512):
    """Forward pass of Net: relu(x @ W1 + b1) @ W2 + b2.

    x: (B, 784) f32 or bf16; params as produced by prepare_params.
    Returns (B, NUM_CLASSES) f32.
    """
    B, D = x.shape
    assert D == INPUT_SIZE

    # Batch tile: multiple of 8 sublanes, capped at `tm` rows.  The grid is
    # cdiv(B, tm_eff); the (possibly partial) last tile's OOB output rows are
    # masked by Mosaic and, since rows are independent, never affect rows < B.
    tm_eff = min(tm, _round_up(B, 8))
    grid = (pl.cdiv(B, tm_eff),)

    flops = 2 * B * (D * HIDDEN_PAD + HIDDEN_PAD * OUT_PAD)
    bytes_accessed = (B * D * x.dtype.itemsize            # x (native dtype)
                      + D * HIDDEN_PAD * 2                # w1 (bf16)
                      + HIDDEN_PAD * OUT_PAD * 2          # w2 (bf16)
                      + (HIDDEN_PAD + OUT_PAD) * 4        # biases (f32)
                      + B * OUT_PAD * 2)                  # output (bf16)

    vmem = pltpu.MemorySpace.VMEM
    out = pl.pallas_call(
        mlp_kernel,
        out_shape=jax.ShapeDtypeStruct((B, OUT_PAD), jnp.bfloat16),
        grid=grid,
        in_specs=[
            # x tile: marches along the batch (software-pipelined).
            pl.BlockSpec((tm_eff, D), lambda i: (i, 0), memory_space=vmem),
            # Weights / biases: constant index_map -> stay resident in VMEM
            # across grid steps (Mosaic does not re-DMA unchanged blocks).
            pl.BlockSpec((D, HIDDEN_PAD), lambda i: (0, 0), memory_space=vmem),
            pl.BlockSpec((1, HIDDEN_PAD), lambda i: (0, 0), memory_space=vmem),
            pl.BlockSpec((HIDDEN_PAD, OUT_PAD), lambda i: (0, 0), memory_space=vmem),
            pl.BlockSpec((1, OUT_PAD), lambda i: (0, 0), memory_space=vmem),
        ],
        out_specs=pl.BlockSpec((tm_eff, OUT_PAD), lambda i: (i, 0),
                               memory_space=vmem),
        compiler_params=pltpu.CompilerParams(
            dimension_semantics=("parallel",)),
        cost_estimate=pl.CostEstimate(flops=flops, transcendentals=0,
                                      bytes_accessed=bytes_accessed),
    )(x, w1p, b1p, w2p, b2p)

    # Slice off the lane-padded output columns; return f32 logits like PyTorch.
    return out[:, :NUM_CLASSES].astype(jnp.float32)


def init_linear_params(key, in_features, out_features):
    # Mimic PyTorch nn.Linear default init: U(-1/sqrt(fan_in), 1/sqrt(fan_in)).
    kw, kb = jax.random.split(key)
    bound = 1.0 / jnp.sqrt(jnp.float32(in_features))
    # Stored as (in_features, out_features) so the kernel does x @ W.
    w = jax.random.uniform(kw, (in_features, out_features), jnp.float32,
                           minval=-bound, maxval=bound)
    b = jax.random.uniform(kb, (1, out_features), jnp.float32,
                           minval=-bound, maxval=bound)
    return w, b


if __name__ == "__main__":
    key = jax.random.PRNGKey(0)
    k_x, k_fc1, k_fc2 = jax.random.split(key, 3)

    batch = 8
    x = jax.random.normal(k_x, (batch, INPUT_SIZE), jnp.float32)

    w1, b1 = init_linear_params(k_fc1, INPUT_SIZE, HIDDEN_SIZE)
    w2, b2 = init_linear_params(k_fc2, HIDDEN_SIZE, NUM_CLASSES)

    w1p, b1p, w2p, b2p = prepare_params(w1, b1, w2, b2)

    out = mlp_forward(x, w1p, b1p, w2p, b2p)
    out = jax.block_until_ready(out)

    # Reference in plain f32 JAX; tolerance relaxed because the kernel uses
    # bf16 MXU operands and bf16 logit writeback (f32 accumulation keeps error
    # well within 5e-2 for these magnitudes).
    ref = jnp.maximum(x @ w1 + b1, 0.0) @ w2 + b2
    assert out.shape == (batch, NUM_CLASSES)
    assert jnp.allclose(out, ref, atol=5e-2, rtol=5e-2), (
        f"max abs err {jnp.max(jnp.abs(out - ref))}")

    print("KERNEL_OK")
</pallas_src>

<mosaic_0001>
module attributes {stable_mosaic.version = 11 : i64} {
  func.func @mlp_kernel(%arg0: i32, %arg1: memref<8x784xf32, #tpu.memory_space<vmem>>, %arg2: memref<784x512xbf16, #tpu.memory_space<vmem>>, %arg3: memref<1x512xf32, #tpu.memory_space<vmem>>, %arg4: memref<512x128xbf16, #tpu.memory_space<vmem>>, %arg5: memref<1x128xf32, #tpu.memory_space<vmem>>, %arg6: memref<8x128xbf16, #tpu.memory_space<vmem>>) attributes {dimension_semantics = [#tpu.dimension_semantics<parallel>], iteration_bounds = array<i64: 1>, scalar_prefetch = 0 : i64, scratch_operands = 0 : i64, tpu.core_type = #tpu.core_type<tc>, window_params = [{transform_indices = @transform_0, window_bounds = array<i64: 8, 784>}, {pipeline_mode = #tpu.pipeline_mode<synchronous>, transform_indices = @transform_1, window_bounds = array<i64: 784, 512>}, {pipeline_mode = #tpu.pipeline_mode<synchronous>, transform_indices = @transform_2, window_bounds = array<i64: 1, 512>}, {pipeline_mode = #tpu.pipeline_mode<synchronous>, transform_indices = @transform_3, window_bounds = array<i64: 512, 128>}, {pipeline_mode = #tpu.pipeline_mode<synchronous>, transform_indices = @transform_4, window_bounds = array<i64: 1, 128>}, {transform_indices = @transform_5, window_bounds = array<i64: 8, 128>}]} {
    %c0 = arith.constant 0 : index
    %c0_0 = arith.constant 0 : index
    %0 = vector.load %arg1[%c0, %c0_0] : memref<8x784xf32, #tpu.memory_space<vmem>>, vector<8x784xf32>
    %1 = arith.truncf %0 : vector<8x784xf32> to vector<8x784xbf16>
    %c0_1 = arith.constant 0 : index
    %c0_2 = arith.constant 0 : index
    %2 = vector.load %arg2[%c0_1, %c0_2] : memref<784x512xbf16, #tpu.memory_space<vmem>>, vector<784x512xbf16>
    %cst = arith.constant dense<0.000000e+00> : vector<8x512xf32>
    %3 = tpu.matmul %1, %2, %cst {dimension_numbers = #tpu.dot_dimension_numbers<[1], [0], [0], [1], [0, 0, 1, 1], [], []>} : vector<8x784xbf16>, vector<784x512xbf16>, vector<8x512xf32> -> vector<8x512xf32>
    %c0_3 = arith.constant 0 : index
    %c0_4 = arith.constant 0 : index
    %4 = vector.load %arg3[%c0_3, %c0_4] : memref<1x512xf32, #tpu.memory_space<vmem>>, vector<1x512xf32>
    %5 = vector.broadcast %4 : vector<1x512xf32> to vector<8x512xf32>
    %6 = arith.addf %3, %5 : vector<8x512xf32>
    %cst_5 = arith.constant 0.000000e+00 : f32
    %7 = vector.broadcast %cst_5 : f32 to vector<8x512xf32>
    %8 = arith.maximumf %6, %7 : vector<8x512xf32>
    %9 = arith.truncf %8 : vector<8x512xf32> to vector<8x512xbf16>
    %c0_6 = arith.constant 0 : index
    %c0_7 = arith.constant 0 : index
    %10 = vector.load %arg4[%c0_6, %c0_7] : memref<512x128xbf16, #tpu.memory_space<vmem>>, vector<512x128xbf16>
    %cst_8 = arith.constant dense<0.000000e+00> : vector<8x128xf32>
    %11 = tpu.matmul %9, %10, %cst_8 {dimension_numbers = #tpu.dot_dimension_numbers<[1], [0], [0], [1], [0, 0, 1, 1], [], []>} : vector<8x512xbf16>, vector<512x128xbf16>, vector<8x128xf32> -> vector<8x128xf32>
    %c0_9 = arith.constant 0 : index
    %c0_10 = arith.constant 0 : index
    %12 = vector.load %arg5[%c0_9, %c0_10] : memref<1x128xf32, #tpu.memory_space<vmem>>, vector<1x128xf32>
    %13 = vector.broadcast %12 : vector<1x128xf32> to vector<8x128xf32>
    %14 = arith.addf %11, %13 : vector<8x128xf32>
    %15 = arith.truncf %14 : vector<8x128xf32> to vector<8x128xbf16>
    %c0_11 = arith.constant 0 : index
    %c0_12 = arith.constant 0 : index
    %16 = vector.load %arg6[%c0_11, %c0_12] : memref<8x128xbf16, #tpu.memory_space<vmem>>, vector<8x128xbf16>
    tpu.vector_store %arg6[%c0_11, %c0_12], %15 {strides = array<i32>} : memref<8x128xbf16, #tpu.memory_space<vmem>>, vector<8x128xbf16>,
    return
  }
  func.func @transform_0(%arg0: i32) -> (i32, i32) {
    %c0_i32 = arith.constant 0 : i32
    %c0_i32_0 = arith.constant 0 : i32
    return %arg0, %c0_i32 : i32, i32
  }
  func.func @transform_1(%arg0: i32) -> (i32, i32) {
    %c0_i32 = arith.constant 0 : i32
    %c0_i32_0 = arith.constant 0 : i32
    %c0_i32_1 = arith.constant 0 : i32
    return %c0_i32, %c0_i32_0 : i32, i32
  }
  func.func @transform_2(%arg0: i32) -> (i32, i32) {
    %c0_i32 = arith.constant 0 : i32
    %c0_i32_0 = arith.constant 0 : i32
    %c0_i32_1 = arith.constant 0 : i32
    return %c0_i32, %c0_i32_0 : i32, i32
  }
  func.func @transform_3(%arg0: i32) -> (i32, i32) {
    %c0_i32 = arith.constant 0 : i32
    %c0_i32_0 = arith.constant 0 : i32
    %c0_i32_1 = arith.constant 0 : i32
    return %c0_i32, %c0_i32_0 : i32, i32
  }
  func.func @transform_4(%arg0: i32) -> (i32, i32) {
    %c0_i32 = arith.constant 0 : i32
    %c0_i32_0 = arith.constant 0 : i32
    %c0_i32_1 = arith.constant 0 : i32
    return %c0_i32, %c0_i32_0 : i32, i32
  }
  func.func @transform_5(%arg0: i32) -> (i32, i32) {
    %c0_i32 = arith.constant 0 : i32
    %c0_i32_0 = arith.constant 0 : i32
    return %arg0, %c0_i32 : i32, i32
  }
}

</mosaic_0001>

<bundles_post_ra>
// kernel: mlp_forward.1
= control target key start
LH: loop header
LB: loop body
LE: loop exit
PB: predicated region body
PF: predicated region fallthrough
CT: control target
= control target key end

     0   :  { %10 = vsyncpa [#allocation3], 0  ;;  %s3352_s0 = inlined_call_operand.hbm [shape: f32[8,784], index: 0, kind: input, shape index: {}]   ;;  %s3353_s1 = inlined_call_operand.hbm [shape: bf16[784,512], index: 1, kind: input, shape index: {}]   ;;  %s3354_s2 = inlined_call_operand.hbm [shape: f32[1,512], index: 2, kind: input, shape index: {}]   ;;  %s3355_s3 = inlined_call_operand.hbm [shape: bf16[512,128], index: 3, kind: input, shape index: {}]   ;;  %s3356_s4 = inlined_call_operand.vmem [shape: f32[1,128], index: 4, kind: input, shape index: {}]   ;;  %s3357_s5 = inlined_call_operand.vmem [shape: bf16[8,128], index: 5, kind: output, shape index: {}]  }
   0x1   :  { %11 = vsyncpa [#allocation5], 0  ;;  %s28_s20 = sshll.u32 %s3353_s1, 4  ;;  %s29_s20 = int_to_ptr.hbm [resolvable:$true] %s28_s20 }
   0x2   :  { %12 = vsyncpa [#allocation8], 0  ;;  %s3232_s21 = smov [#allocation4]   ;;  %s18_s25 = sshll.u32 %s3352_s0, 4  ;;  %s19_s25 = int_to_ptr.hbm [resolvable:$true] %s18_s25 }
   0x3   :  { %s30_s22 = sshll.u32 %s3232_s21, 4  ;;  %s3233_s26 = smov 256   ;;  %s31_s22 = int_to_ptr.vmem [resolvable:$true] %s30_s22 }
   0x4   :  { %s3234_s27 = smov 16   ;;  %s3235_s28 = smov [#allocation2]  }
   0x5   :  { %36 = dma.hbm_to_vmem [thread:$0]  %s29_s20, 25088, %s31_s22, [#allocation5], %s3233_s26, %s3233_s26, %s3234_s27  }
   0x6   :  { %s20_s29 = sshll.u32 %s3235_s28, 4  ;;  %s42_s7 = sshll.u32 %s3354_s2, 4  ;;  %s21_s29 = int_to_ptr.vmem [resolvable:$true] %s20_s29  ;;  %s43_s7 = int_to_ptr.hbm [resolvable:$true] %s42_s7 }
   0x7   :  { %23 = dma.hbm_to_vmem [thread:$0]  %s19_s25, 896, %s21_s29, [#allocation3]  }
   0x8   :  { %s52_s9 = sshll.u32 %s3355_s3, 4  ;;  %s3236_s10 = smov [#allocation6]   ;;  %s53_s9 = int_to_ptr.hbm [resolvable:$true] %s52_s9 }
   0x9   :  { %s44_s11 = sshll.u32 %s3236_s10, 4  ;;  %s3237_s0 = smov [#allocation7]   ;;  %s45_s11 = int_to_ptr.vmem [resolvable:$true] %s44_s11 }
   0xa   :  { %47 = dma.hbm_to_vmem [thread:$0]  %s43_s7, 64, %s45_s11, [#allocation5]  }
   0xb   :  { %s54_s12 = sshll.u32 %s3237_s0, 4  ;;  %s3238_s13 = smov 64   ;;  %s55_s12 = int_to_ptr.vmem [resolvable:$true] %s54_s12 }
   0xc   :  { %s3239_s14 = smov 4  }
   0xd   :  { %60 = dma.hbm_to_vmem [thread:$0]  %s53_s9, 4096, %s55_s12, [#allocation8], %s3238_s13, %s3238_s13, %s3239_s14  }
   0xe   :  { %3226 = dma.done.wait [#allocation3], 896  }
   0xf   :  { %3227 = vsyncadd [#allocation3], 4294966400 }
  0x10   :  { %3228 = dma.done.wait [#allocation5], 25152  }
  0x11   :  { %3229 = vsyncadd [#allocation5], 4294942144 }
  0x12   :  { %3230 = dma.done.wait [#allocation8], 4096  }
  0x13   :  { %3231 = vsyncadd [#allocation8], 4294963200  ;;  %v2091_v0 = vld [vmem:[#allocation4 + $0xe0] sm:$0xf]  ;;  %v2923_v1 = vld [vmem:[#allocation4 + $0xec] sm:$0xf0] }
  0x14   :  { %v2219_v2 = vld [vmem:[#allocation4 + $0x1e0] sm:$0xf]  ;;  %v2092_v3 = vor.u32 %v2923_v1, %v2091_v0  ;;  %v2955_v4 = vld [vmem:[#allocation4 + $0x1ec] sm:$0xf0]  ;;  %vm1280_vm0 = vcmask 130048  }
  0x15   :  { %v2347_v5 = vld [vmem:[#allocation4 + $0x2e0] sm:$0xf]  ;;  %v2987_v6 = vld [vmem:[#allocation4 + $0x2ec] sm:$0xf0]  ;;  %v2220_v7 = vor.u32 %v2955_v4, %v2219_v2 }
  0x16   :  { %v2348_v8 = vor.u32 %v2987_v6, %v2347_v5  ;;  %v2475_v9 = vld [vmem:[#allocation4 + $0x3e0] sm:$0xf]  ;;  %v3019_v10 = vld [vmem:[#allocation4 + $0x3ec] sm:$0xf0]  ;;  %1284 = vmatpush.bf16.msra.mxu0 %v2092_v3 }
  0x17   :  { %v2075_v11 = vld [vmem:[#allocation4 + $0xc0] sm:$0xf]  ;;  %v2476_v12 = vor.u32 %v3019_v10, %v2475_v9  ;;  %v2919_v13 = vld [vmem:[#allocation4 + $0xcc] sm:$0xf0]  ;;  %1297 = vmatpush.bf16.msra.mxu1 %v2220_v7 }
  0x18   :  { %v2203_v14 = vld [vmem:[#allocation4 + $0x1c0] sm:$0xf]  ;;  %v2951_v15 = vld [vmem:[#allocation4 + $0x1cc] sm:$0xf0]  ;;  %1310 = vmatpush.bf16.msra.mxu2 %v2348_v8  ;;  %v2076_v16 = vor.u32 %v2919_v13, %v2075_v11 }
  0x19   :  { %v2204_v17 = vor.u32 %v2951_v15, %v2203_v14  ;;  %v2331_v18 = vld [vmem:[#allocation4 + $0x2c0] sm:$0xf]  ;;  %v2983_v19 = vld [vmem:[#allocation4 + $0x2cc] sm:$0xf0]  ;;  %1323 = vmatpush.bf16.msra.mxu3 %v2476_v12 }
  0x1a   :  { %v2459_v20 = vld [vmem:[#allocation4 + $0x3c0] sm:$0xf]  ;;  %v2332_v21 = vor.u32 %v2983_v19, %v2331_v18  ;;  %v3015_v22 = vld [vmem:[#allocation4 + $0x3cc] sm:$0xf0]  ;;  %1285 = vmatpush.bf16.msra.mxu0 %v2076_v16 }
  0x1b   :  { %v2059_v23 = vld [vmem:[#allocation4 + $0xa0] sm:$0xf]  ;;  %v2915_v24 = vld [vmem:[#allocation4 + $0xac] sm:$0xf0]  ;;  %v2460_v25 = vor.u32 %v3015_v22, %v2459_v20  ;;  %1298 = vmatpush.bf16.msra.mxu1 %v2204_v17 }
  0x1c   :  { %v2187_v26 = vld [vmem:[#allocation4 + $0x1a0] sm:$0xf]  ;;  %v2947_v27 = vld [vmem:[#allocation4 + $0x1ac] sm:$0xf0]  ;;  %v2060_v29 = vor.u32 %v2915_v24, %v2059_v23  ;;  %1311 = vmatpush.bf16.msra.mxu2 %v2332_v21 }
  0x1d   :  { %v2315_v28 = vld [vmem:[#allocation4 + $0x2a0] sm:$0xf]  ;;  %v2979_v30 = vld [vmem:[#allocation4 + $0x2ac] sm:$0xf0]  ;;  %v2188_v33 = vor.u32 %v2947_v27, %v2187_v26  ;;  %1324 = vmatpush.bf16.msra.mxu3 %v2460_v25 }
  0x1e   :  { %v2443_v31 = vld [vmem:[#allocation4 + $0x3a0] sm:$0xf]  ;;  %v3011_v32 = vld [vmem:[#allocation4 + $0x3ac] sm:$0xf0]  ;;  %v2316_v34 = vor.u32 %v2979_v30, %v2315_v28  ;;  %1286 = vmatpush.bf16.msra.mxu0 %v2060_v29 }
  0x1f   :  { %v2043_v35 = vld [vmem:[#allocation4 + $0x80] sm:$0xf]  ;;  %v2911_v36 = vld [vmem:[#allocation4 + $0x8c] sm:$0xf0]  ;;  %v2444_v38 = vor.u32 %v3011_v32, %v2443_v31  ;;  %1299 = vmatpush.bf16.msra.mxu1 %v2188_v33  ;;  %v2921_v33 = vld [vmem:[#allocation4 + $0xe4] sm:$0xf] }
  0x20   :  { %v2171_v37 = vld [vmem:[#allocation4 + $0x180] sm:$0xf]  ;;  %v2943_v39 = vld [vmem:[#allocation4 + $0x18c] sm:$0xf0]  ;;  %v2044_v44 = vor.u32 %v2911_v36, %v2043_v35  ;;  %1312 = vmatpush.bf16.msra.mxu2 %v2316_v34  ;;  %v2093_v34 = vld [vmem:[#allocation4 + $0xf0] sm:$0xf0] }
  0x21   :  { %v2299_v40 = vld [vmem:[#allocation4 + $0x280] sm:$0xf]  ;;  %v2975_v41 = vld [vmem:[#allocation4 + $0x28c] sm:$0xf0]  ;;  %v2172_v45 = vor.u32 %v2943_v39, %v2171_v37  ;;  %1325 = vmatpush.bf16.msra.mxu3 %v2444_v38  ;;  %v82_v35 = vld [vmem:[#allocation2 + $0x10] sm:$0xff] }
  0x22   :  { %v2427_v42 = vld [vmem:[#allocation4 + $0x380] sm:$0xf]  ;;  %v3007_v43 = vld [vmem:[#allocation4 + $0x38c] sm:$0xf0]  ;;  %v2300_v46 = vor.u32 %v2975_v41, %v2299_v40  ;;  %1287 = vmatpush.bf16.msra.mxu0 %v2044_v44  ;;  %v80_v40 = vld [vmem:[#allocation2] sm:$0xff] }
  0x23   :  { %v2027_v47 = vld [vmem:[#allocation4 + $0x60] sm:$0xf]  ;;  %v2907_v48 = vld [vmem:[#allocation4 + $0x6c] sm:$0xf0]  ;;  %v2428_v50 = vor.u32 %v3007_v43, %v2427_v42  ;;  %1300 = vmatpush.bf16.msra.mxu1 %v2172_v45  ;;  %v2953_v43 = vld [vmem:[#allocation4 + $0x1e4] sm:$0xf] }
  0x24   :  { %v2155_v49 = vld [vmem:[#allocation4 + $0x160] sm:$0xf]  ;;  %v2939_v51 = vld [vmem:[#allocation4 + $0x16c] sm:$0xf0]  ;;  %v2028_v56 = vor.u32 %v2907_v48, %v2027_v47  ;;  %1313 = vmatpush.bf16.msra.mxu2 %v2300_v46  ;;  %v2221_v44 = vld [vmem:[#allocation4 + $0x1f0] sm:$0xf0]  ;;  %v2096_v47 = vor.u32 %v2921_v33, %v2093_v34 }
  0x25   :  { %v2283_v52 = vld [vmem:[#allocation4 + $0x260] sm:$0xf]  ;;  %v2971_v53 = vld [vmem:[#allocation4 + $0x26c] sm:$0xf0]  ;;  %v2156_v57 = vor.u32 %v2939_v51, %v2155_v49  ;;  %1326 = vmatpush.bf16.msra.mxu3 %v2428_v50  ;;  %v3282_v51 = vpack.c.bf16 %v82_v35, %v82_v35  ;;  %v2937_v35 = vld [vmem:[#allocation4 + $0x164] sm:$0xf] }
  0x26   :  { %v2411_v54 = vld [vmem:[#allocation4 + $0x360] sm:$0xf]  ;;  %v3003_v55 = vld [vmem:[#allocation4 + $0x36c] sm:$0xf0]  ;;  %v2284_v58 = vor.u32 %v2971_v53, %v2283_v52  ;;  %1288 = vmatpush.bf16.msra.mxu0 %v2028_v56  ;;  %v2917_v53 = vld [vmem:[#allocation4 + $0xc4] sm:$0xf] }
  0x27   :  { %v2011_v59 = vld [vmem:[#allocation4 + $0x40] sm:$0xf]  ;;  %v2903_v60 = vld [vmem:[#allocation4 + $0x4c] sm:$0xf0]  ;;  %v2412_v62 = vor.u32 %v3003_v55, %v2411_v54  ;;  %1301 = vmatpush.bf16.msra.mxu1 %v2156_v57  ;;  %v2077_v54 = vld [vmem:[#allocation4 + $0xd0] sm:$0xf0]  ;;  %v3284_v55 = vpack.c.bf16 %v80_v40, %v80_v40 }
  0x28   :  { %v2139_v61 = vld [vmem:[#allocation4 + $0x140] sm:$0xf]  ;;  %v2935_v63 = vld [vmem:[#allocation4 + $0x14c] sm:$0xf0]  ;;  %v2012_v4 = vor.u32 %v2903_v60, %v2011_v59  ;;  %1314 = vmatpush.bf16.msra.mxu2 %v2284_v58  ;;  %v2224_v59 = vor.u32 %v2953_v43, %v2221_v44  ;;  %v2901_v43 = vld [vmem:[#allocation4 + $0x44] sm:$0xf] }
  0x29   :  { %v2267_v0 = vld [vmem:[#allocation4 + $0x240] sm:$0xf]  ;;  %v2967_v1 = vld [vmem:[#allocation4 + $0x24c] sm:$0xf0]  ;;  %v2140_v5 = vor.u32 %v2935_v63, %v2139_v61  ;;  %1327 = vmatpush.bf16.msra.mxu3 %v2412_v62  ;;  %v2949_v61 = vld [vmem:[#allocation4 + $0x1c4] sm:$0xf] }
  0x2a   :  { %v2395_v2 = vld [vmem:[#allocation4 + $0x340] sm:$0xf]  ;;  %v2999_v3 = vld [vmem:[#allocation4 + $0x34c] sm:$0xf0]  ;;  %v2268_v6 = vor.u32 %v2967_v1, %v2267_v0  ;;  %1289 = vmatpush.bf16.msra.mxu0 %v2012_v4  ;;  %v2205_v62 = vld [vmem:[#allocation4 + $0x1d0] sm:$0xf0]  ;;  %v2080_v0 = vor.u32 %v2917_v53, %v2077_v54 }
  0x2b   :  { %v1995_v7 = vld [vmem:[#allocation4 + $0x20] sm:$0xf]  ;;  %v2899_v8 = vld [vmem:[#allocation4 + $0x2c] sm:$0xf0]  ;;  %v2396_v10 = vor.u32 %v2999_v3, %v2395_v2  ;;  %1302 = vmatpush.bf16.msra.mxu1 %v2140_v5  ;;  %v2913_v5 = vld [vmem:[#allocation4 + $0xa4] sm:$0xf] }
  0x2c   :  { %v2123_v9 = vld [vmem:[#allocation4 + $0x120] sm:$0xf]  ;;  %v2931_v11 = vld [vmem:[#allocation4 + $0x12c] sm:$0xf0]  ;;  %v1996_v16 = vor.u32 %v2899_v8, %v1995_v7  ;;  %1315 = vmatpush.bf16.msra.mxu2 %v2268_v6  ;;  %v2061_v6 = vld [vmem:[#allocation4 + $0xb0] sm:$0xf0]  ;;  %v2208_v8 = vor.u32 %v2949_v61, %v2205_v62 }
  0x2d   :  { %v2251_v12 = vld [vmem:[#allocation4 + $0x220] sm:$0xf]  ;;  %v2963_v13 = vld [vmem:[#allocation4 + $0x22c] sm:$0xf0]  ;;  %v2124_v20 = vor.u32 %v2931_v11, %v2123_v9  ;;  %1328 = vmatpush.bf16.msra.mxu3 %v2396_v10  ;;  %v2945_v10 = vld [vmem:[#allocation4 + $0x1a4] sm:$0xf] }
  0x2e   :  { %v2379_v14 = vld [vmem:[#allocation4 + $0x320] sm:$0xf]  ;;  %v2995_v15 = vld [vmem:[#allocation4 + $0x32c] sm:$0xf0]  ;;  %v2252_v21 = vor.u32 %v2963_v13, %v2251_v12  ;;  %1290 = vmatpush.bf16.msra.mxu0 %v1996_v16  ;;  %v2189_v11 = vld [vmem:[#allocation4 + $0x1b0] sm:$0xf0]  ;;  %v2064_v13 = vor.u32 %v2913_v5, %v2061_v6 }
  0x2f   :  { %v1979_v17 = vld [vmem:[#allocation4] sm:$0xf]  ;;  %v2895_v18 = vld [vmem:[#allocation4 + $0xc] sm:$0xf0]  ;;  %v2380_v25 = vor.u32 %v2995_v15, %v2379_v14  ;;  %1303 = vmatpush.bf16.msra.mxu1 %v2124_v20  ;;  %v2192_v20 = vor.u32 %v2945_v10, %v2189_v11  ;;  %v2013_v44 = vld [vmem:[#allocation4 + $0x50] sm:$0xf0] }
  0x30   :  { %v2107_v19 = vld [vmem:[#allocation4 + $0x100] sm:$0xf]  ;;  %v2927_v22 = vld [vmem:[#allocation4 + $0x10c] sm:$0xf0]  ;;  %v1980_v32 = vor.u32 %v2895_v18, %v1979_v17  ;;  %1316 = vmatpush.bf16.msra.mxu2 %v2252_v21  ;;  %v2909_v18 = vld [vmem:[#allocation4 + $0x84] sm:$0xf] }
  0x31   :  { %v2235_v23 = vld [vmem:[#allocation4 + $0x200] sm:$0xf]  ;;  %v2959_v24 = vld [vmem:[#allocation4 + $0x20c] sm:$0xf0]  ;;  %v2108_v36 = vor.u32 %v2927_v22, %v2107_v19  ;;  %1329 = vmatpush.bf16.msra.mxu3 %v2380_v25  ;;  %v2045_v19 = vld [vmem:[#allocation4 + $0x90] sm:$0xf0] }
  0x32   :  { %v2363_v26 = vld [vmem:[#allocation4 + $0x300] sm:$0xf]  ;;  %v2991_v27 = vld [vmem:[#allocation4 + $0x30c] sm:$0xf0]  ;;  %v2236_v37 = vor.u32 %v2959_v24, %v2235_v23  ;;  %1291 = vmatpush.bf16.msra.mxu0 %v1980_v32  ;;  %v2941_v22 = vld [vmem:[#allocation4 + $0x184] sm:$0xf]  ;;  %v2048_v25 = vor.u32 %v2909_v18, %v2045_v19 }
  0x33   :  { %v2603_v28 = vld [vmem:[#allocation4 + $0x4e0] sm:$0xf]  ;;  %v3051_v29 = vld [vmem:[#allocation4 + $0x4ec] sm:$0xf0]  ;;  %v2364_v41 = vor.u32 %v2991_v27, %v2363_v26  ;;  %1304 = vmatpush.bf16.msra.mxu1 %v2108_v36  ;;  %v2173_v23 = vld [vmem:[#allocation4 + $0x190] sm:$0xf0] }
  0x34   :  { %v2731_v30 = vld [vmem:[#allocation4 + $0x5e0] sm:$0xf]  ;;  %v3083_v31 = vld [vmem:[#allocation4 + $0x5ec] sm:$0xf0]  ;;  %v2604_v42 = vor.u32 %v3051_v29, %v2603_v28  ;;  %1317 = vmatpush.bf16.msra.mxu2 %v2236_v37  ;;  %v86_v32 = vld [vmem:[#allocation2 + $0x30] sm:$0xff]  ;;  %v2176_v33 = vor.u32 %v2941_v22, %v2173_v23 }
  0x35   :  { %v2747_v38 = vld [vmem:[#allocation4 + $0x600] sm:$0xf]  ;;  %v3087_v39 = vld [vmem:[#allocation4 + $0x60c] sm:$0xf0]  ;;  %v2732_v46 = vor.u32 %v3083_v31, %v2731_v30  ;;  %1330 = vmatpush.bf16.msra.mxu3 %v2364_v41  ;;  %1292 = vmatmul.bf16.vlgmr.msra.gmra.mxu0 %v3284_v55  ;;  %v2905_v30 = vld [vmem:[#allocation4 + $0x64] sm:$0xf] }
  0x36   :  { %v83_v45 = vld [vmem:[#allocation2 + $0x18] sm:$0xff]  ;;  %v3047_v49 = vld [vmem:[#allocation4 + $0x4cc] sm:$0xf0]  ;;  %v2748_v56 = vor.u32 %v3087_v39, %v2747_v38  ;;  %1336 = vmatpush.bf16.msrb.mxu0 %v2604_v42  ;;  %v2029_v31 = vld [vmem:[#allocation4 + $0x70] sm:$0xf0] }
  0x37   :  { %v2587_v48 = vld [vmem:[#allocation4 + $0x4c0] sm:$0xf]  ;;  %v3079_v52 = vld [vmem:[#allocation4 + $0x5cc] sm:$0xf0]  ;;  %v3286_v57 = vpack.c.bf16 %v83_v45, %v83_v45  ;;  %1349 = vmatpush.bf16.msrb.mxu1 %v2732_v46  ;;  %1318 = vmatmul.bf16.vlgmr.msra.gmra.mxu2 %v3282_v51  ;;  %v2157_v36 = vld [vmem:[#allocation4 + $0x170] sm:$0xf0]  ;;  %v2032_v38 = vor.u32 %v2905_v30, %v2029_v31  ;;  %v3294_v45 = vpack.c.bf16 %v86_v32, %v86_v32 }
  0x38   :  { %v2715_v50 = vld [vmem:[#allocation4 + $0x5c0] sm:$0xf]  ;;  %v81_v58 = vld [vmem:[#allocation2 + $0x8] sm:$0xff]  ;;  %v2588_v60 = vor.u32 %v3047_v49, %v2587_v48  ;;  %1369 = vmatpush.bf16.msrb.mxu2 %v2748_v56  ;;  %v2160_v46 = vor.u32 %v2937_v35, %v2157_v36  ;;  %v2933_v48 = vld [vmem:[#allocation4 + $0x144] sm:$0xf] }
  0x39   :  { %1375 = vmatpush.bf16.msrb.mxu3 %v2096_v47  ;;  %v2716_v63 = vor.u32 %v3079_v52, %v2715_v50  ;;  %v2571_v1 = vld [vmem:[#allocation4 + $0x4a0] sm:$0xf]  ;;  %v3043_v2 = vld [vmem:[#allocation4 + $0x4ac] sm:$0xf0]  ;;  %v3290_v7 = vpack.c.bf16 %v81_v58, %v81_v58  ;;  %v2141_v49 = vld [vmem:[#allocation4 + $0x150] sm:$0xf0]  ;;  %v2016_v52 = vor.u32 %v2901_v43, %v2013_v44 }
  0x3a   :  { %v2699_v3 = vld [vmem:[#allocation4 + $0x5a0] sm:$0xf]  ;;  %v3075_v4 = vld [vmem:[#allocation4 + $0x5ac] sm:$0xf0]  ;;  %1331 = vmatmul.bf16.vlgmr.msra.gmra.mxu3 %v3286_v57  ;;  %1337 = vmatpush.bf16.msrb.mxu0 %v2588_v60  ;;  %v2572_v9 = vor.u32 %v3043_v2, %v2571_v1  ;;  %v1997_v60 = vld [vmem:[#allocation4 + $0x30] sm:$0xf0]  ;;  %v2144_v61 = vor.u32 %v2933_v48, %v2141_v49 }
  0x3b   :  { %1350 = vmatpush.bf16.msrb.mxu1 %v2716_v63  ;;  %v2700_v12 = vor.u32 %v3075_v4, %v2699_v3  ;;  %v2555_v14 = vld [vmem:[#allocation4 + $0x480] sm:$0xf]  ;;  %v3039_v15 = vld [vmem:[#allocation4 + $0x48c] sm:$0xf0]  ;;  %v2929_v63 = vld [vmem:[#allocation4 + $0x124] sm:$0xf] }
  0x3c   :  { %1388 = vmatpush.bf16.msra.mxu2 %v2224_v59  ;;  %v2683_v16 = vld [vmem:[#allocation4 + $0x580] sm:$0xf]  ;;  %1305 = vmatmul.bf16.vlgmr.msra.gmra.mxu1 %v3290_v7  ;;  %v3071_v17 = vld [vmem:[#allocation4 + $0x58c] sm:$0xf0]  ;;  %v2556_v21 = vor.u32 %v3039_v15, %v2555_v14  ;;  %v2897_v59 = vld [vmem:[#allocation4 + $0x24] sm:$0xf] }
  0x3d   :  { %1376 = vmatpush.bf16.msrb.mxu3 %v2080_v0  ;;  %v2684_v24 = vor.u32 %v3071_v17, %v2683_v16  ;;  %v2539_v26 = vld [vmem:[#allocation4 + $0x460] sm:$0xf]  ;;  %v3035_v27 = vld [vmem:[#allocation4 + $0x46c] sm:$0xf0]  ;;  %v2125_v0 = vld [vmem:[#allocation4 + $0x130] sm:$0xf0]  ;;  %v2000_v3 = vor.u32 %v2897_v59, %v1997_v60 }
  0x3e   :  { %1338 = vmatpush.bf16.msrb.mxu0 %v2572_v9  ;;  %v2667_v28 = vld [vmem:[#allocation4 + $0x560] sm:$0xf]  ;;  %v3067_v29 = vld [vmem:[#allocation4 + $0x56c] sm:$0xf0]  ;;  %v2540_v34 = vor.u32 %v3035_v27, %v2539_v26  ;;  %v1981_v9 = vld [vmem:[#allocation4 + $0x10] sm:$0xf0]  ;;  %v2128_v14 = vor.u32 %v2929_v63, %v2125_v0 }
  0x3f   :  { %1351 = vmatpush.bf16.msrb.mxu1 %v2700_v12  ;;  %v2668_v37 = vor.u32 %v3067_v29, %v2667_v28  ;;  %v2523_v39 = vld [vmem:[#allocation4 + $0x440] sm:$0xf]  ;;  %v3031_v40 = vld [vmem:[#allocation4 + $0x44c] sm:$0xf0]  ;;  %v2985_v10 = vld [vmem:[#allocation4 + $0x2e4] sm:$0xf] }
  0x40   :  { %1389 = vmatpush.bf16.msra.mxu2 %v2208_v8  ;;  %v2651_v41 = vld [vmem:[#allocation4 + $0x540] sm:$0xf]  ;;  %v3063_v42 = vld [vmem:[#allocation4 + $0x54c] sm:$0xf0]  ;;  %v2524_v47 = vor.u32 %v3031_v40, %v2523_v39  ;;  %v2893_v8 = vld [vmem:[#allocation4 + $0x4] sm:$0xf] }
  0x41   :  { %1377 = vmatpush.bf16.msrb.mxu3 %v2064_v13  ;;  %v2652_v50 = vor.u32 %v3063_v42, %v2651_v41  ;;  %v2507_v53 = vld [vmem:[#allocation4 + $0x420] sm:$0xf]  ;;  %v3027_v54 = vld [vmem:[#allocation4 + $0x42c] sm:$0xf0]  ;;  %v2349_v11 = vld [vmem:[#allocation4 + $0x2f0] sm:$0xf0] }
  0x42   :  { %1339 = vmatpush.bf16.msrb.mxu0 %v2556_v21  ;;  %v2635_v56 = vld [vmem:[#allocation4 + $0x520] sm:$0xf]  ;;  %v3059_v58 = vld [vmem:[#allocation4 + $0x52c] sm:$0xf0]  ;;  %v2508_v62 = vor.u32 %v3027_v54, %v2507_v53  ;;  %v3017_v12 = vld [vmem:[#allocation4 + $0x3e4] sm:$0xf] }
  0x43   :  { %1352 = vmatpush.bf16.msrb.mxu1 %v2684_v24  ;;  %v2491_v1 = vld [vmem:[#allocation4 + $0x400] sm:$0xf]  ;;  %v2636_v2 = vor.u32 %v3059_v58, %v2635_v56  ;;  %v3023_v4 = vld [vmem:[#allocation4 + $0x40c] sm:$0xf0]  ;;  %v2477_v13 = vld [vmem:[#allocation4 + $0x3f0] sm:$0xf0]  ;;  %v2352_v24 = vor.u32 %v2985_v10, %v2349_v11 }
  0x44   :  { %1390 = vmatpush.bf16.msra.mxu2 %v2192_v20  ;;  %v2619_v5 = vld [vmem:[#allocation4 + $0x500] sm:$0xf]  ;;  %v3055_v6 = vld [vmem:[#allocation4 + $0x50c] sm:$0xf0]  ;;  %v2492_v15 = vor.u32 %v3023_v4, %v2491_v1  ;;  %v3049_v16 = vld [vmem:[#allocation4 + $0x4e4] sm:$0xf]  ;;  %v1984_v20 = vor.u32 %v2893_v8, %v1981_v9 }
  0x45   :  { %1378 = vmatpush.bf16.msrb.mxu3 %v2048_v25  ;;  %v2605_v17 = vld [vmem:[#allocation4 + $0x4f0] sm:$0xf0]  ;;  %v84_v18 = vld [vmem:[#allocation2 + $0x20] sm:$0xff]  ;;  %v2620_v19 = vor.u32 %v3055_v6, %v2619_v5  ;;  %v2925_v21 = vld [vmem:[#allocation4 + $0x104] sm:$0xf]  ;;  %v2480_v25 = vor.u32 %v3017_v12, %v2477_v13 }
  0x46   :  { %1340 = vmatpush.bf16.msrb.mxu0 %v2540_v34  ;;  %v2109_v22 = vld [vmem:[#allocation4 + $0x110] sm:$0xf0]  ;;  %v3081_v26 = vld [vmem:[#allocation4 + $0x5e4] sm:$0xf]  ;;  %v2608_v29 = vor.u32 %v3049_v16, %v2605_v17  ;;  %v3298_v30 = vpack.c.bf16 %v84_v18, %v84_v18 }
  0x47   :  { %1353 = vmatpush.bf16.msrb.mxu1 %v2668_v37  ;;  %2761 = vmatmul.msk.bf16.vlgmr.msrb.gmra.mxu2 %vm1280_vm0, %v3294_v45  ;;  %v85_v23 = vld [vmem:[#allocation2 + $0x28] sm:$0xff]  ;;  %v2981_v28 = vld [vmem:[#allocation4 + $0x2c4] sm:$0xf]  ;;  %v2112_v34 = vor.u32 %v2925_v21, %v2109_v22 }
  0x48   :  { %1391 = vmatpush.bf16.msra.mxu2 %v2176_v33  ;;  %v2733_v27 = vld [vmem:[#allocation4 + $0x5f0] sm:$0xf0]  ;;  %v3013_v32 = vld [vmem:[#allocation4 + $0x3c4] sm:$0xf]  ;;  %v3300_v35 = vpack.c.bf16 %v85_v23, %v85_v23 }
  0x49   :  { %1379 = vmatpush.bf16.msrb.mxu3 %v2032_v38  ;;  %v2333_v31 = vld [vmem:[#allocation4 + $0x2d0] sm:$0xf0]  ;;  %v3045_v36 = vld [vmem:[#allocation4 + $0x4c4] sm:$0xf]  ;;  %v2736_v38 = vor.u32 %v3081_v26, %v2733_v27 }
  0x4a   :  { %1341 = vmatpush.bf16.msrb.mxu0 %v2524_v47  ;;  %v2461_v33 = vld [vmem:[#allocation4 + $0x3d0] sm:$0xf0]  ;;  %v2336_v39 = vor.u32 %v2981_v28, %v2333_v31  ;;  %v3077_v41 = vld [vmem:[#allocation4 + $0x5c4] sm:$0xf] }
  0x4b   :  { %1354 = vmatpush.bf16.msrb.mxu1 %v2652_v50  ;;  %v2589_v37 = vld [vmem:[#allocation4 + $0x4d0] sm:$0xf0]  ;;  %v2464_v40 = vor.u32 %v3013_v32, %v2461_v33  ;;  %v2977_v43 = vld [vmem:[#allocation4 + $0x2a4] sm:$0xf] }
  0x4c   :  { %1392 = vmatpush.bf16.msra.mxu2 %v2160_v46  ;;  %v2717_v42 = vld [vmem:[#allocation4 + $0x5d0] sm:$0xf0]  ;;  %v2592_v44 = vor.u32 %v3045_v36, %v2589_v37  ;;  %v3009_v47 = vld [vmem:[#allocation4 + $0x3a4] sm:$0xf] }
  0x4d   :  { %1380 = vmatpush.bf16.msrb.mxu3 %v2016_v52  ;;  %v2317_v46 = vld [vmem:[#allocation4 + $0x2b0] sm:$0xf0]  ;;  %v3041_v49 = vld [vmem:[#allocation4 + $0x4a4] sm:$0xf]  ;;  %v2720_v52 = vor.u32 %v3077_v41, %v2717_v42 }
  0x4e   :  { %1342 = vmatpush.bf16.msrb.mxu0 %v2508_v62  ;;  %v2445_v48 = vld [vmem:[#allocation4 + $0x3b0] sm:$0xf0]  ;;  %v2320_v53 = vor.u32 %v2977_v43, %v2317_v46  ;;  %v3073_v56 = vld [vmem:[#allocation4 + $0x5a4] sm:$0xf] }
  0x4f   :  { %1355 = vmatpush.bf16.msrb.mxu1 %v2636_v2  ;;  %v2573_v50 = vld [vmem:[#allocation4 + $0x4b0] sm:$0xf0]  ;;  %v2448_v54 = vor.u32 %v3009_v47, %v2445_v48  ;;  %v2973_v59 = vld [vmem:[#allocation4 + $0x284] sm:$0xf] }
  0x50   :  { %1393 = vmatpush.bf16.msra.mxu2 %v2144_v61  ;;  %v2701_v58 = vld [vmem:[#allocation4 + $0x5b0] sm:$0xf0]  ;;  %v2576_v60 = vor.u32 %v3041_v49, %v2573_v50  ;;  %v3005_v62 = vld [vmem:[#allocation4 + $0x384] sm:$0xf] }
  0x51   :  { %1381 = vmatpush.bf16.msrb.mxu3 %v2000_v3  ;;  %v2301_v61 = vld [vmem:[#allocation4 + $0x290] sm:$0xf0]  ;;  %v3037_v0 = vld [vmem:[#allocation4 + $0x484] sm:$0xf]  ;;  %v2704_v2 = vor.u32 %v3073_v56, %v2701_v58  ;;  %v2099_v56 = vld [vmem:[#allocation4 + $0xe8] sm:$0xf] }
  0x52   :  { %1343 = vmatpush.bf16.msrb.mxu0 %v2492_v15  ;;  %v2429_v63 = vld [vmem:[#allocation4 + $0x390] sm:$0xf0]  ;;  %v2304_v3 = vor.u32 %v2973_v59, %v2301_v61  ;;  %v3069_v5 = vld [vmem:[#allocation4 + $0x584] sm:$0xf]  ;;  %v2924_v58 = vld [vmem:[#allocation4 + $0xf4] sm:$0xf0] }
  0x53   :  { %1356 = vmatpush.bf16.msrb.mxu1 %v2620_v19  ;;  %v2557_v1 = vld [vmem:[#allocation4 + $0x490] sm:$0xf0]  ;;  %v2432_v4 = vor.u32 %v3005_v62, %v2429_v63  ;;  %v2969_v8 = vld [vmem:[#allocation4 + $0x264] sm:$0xf]  ;;  %v2355_v62 = vld [vmem:[#allocation4 + $0x2e8] sm:$0xf] }
  0x54   :  { %1394 = vmatpush.bf16.msra.mxu2 %v2128_v14  ;;  %v2685_v6 = vld [vmem:[#allocation4 + $0x590] sm:$0xf0]  ;;  %v2560_v9 = vor.u32 %v3037_v0, %v2557_v1  ;;  %v3001_v11 = vld [vmem:[#allocation4 + $0x364] sm:$0xf]  ;;  %v2988_v63 = vld [vmem:[#allocation4 + $0x2f4] sm:$0xf0] }
  0x55   :  { %1382 = vmatpush.bf16.msrb.mxu3 %v1984_v20  ;;  %1344 = vmatmul.bf16.vlgmr.msrb.gmra.mxu0 %v3298_v30  ;;  %v2285_v10 = vld [vmem:[#allocation4 + $0x270] sm:$0xf0]  ;;  %v3033_v13 = vld [vmem:[#allocation4 + $0x464] sm:$0xf]  ;;  %v2688_v15 = vor.u32 %v3069_v5, %v2685_v6  ;;  %v2100_v5 = vor.u32 %v2924_v58, %v2099_v56  ;;  %v2483_v6 = vld [vmem:[#allocation4 + $0x3e8] sm:$0xf] }
  0x56   :  { %1401 = vmatpush.bf16.msra.mxu0 %v2352_v24  ;;  %1357 = vmatmul.bf16.vlgmr.msrb.gmra.mxu1 %v3300_v35  ;;  %v2413_v12 = vld [vmem:[#allocation4 + $0x370] sm:$0xf0]  ;;  %v2288_v16 = vor.u32 %v2969_v8, %v2285_v10  ;;  %v3065_v18 = vld [vmem:[#allocation4 + $0x564] sm:$0xf]  ;;  %v3020_v8 = vld [vmem:[#allocation4 + $0x3f4] sm:$0xf0] }
  0x57   :  { %1414 = vmatpush.bf16.msra.mxu1 %v2480_v25  ;;  %v2541_v14 = vld [vmem:[#allocation4 + $0x470] sm:$0xf0]  ;;  %v2416_v17 = vor.u32 %v3001_v11, %v2413_v12  ;;  %v2965_v20 = vld [vmem:[#allocation4 + $0x244] sm:$0xf]  ;;  %v2227_v10 = vld [vmem:[#allocation4 + $0x1e8] sm:$0xf]  ;;  %v2356_v12 = vor.u32 %v2988_v63, %v2355_v62 }
  0x58   :  { %1395 = vmatpush.bf16.msra.mxu2 %v2112_v34  ;;  %1383 = vmatmul.bf16.vlgmr.msrb.gmra.mxu3 %v3284_v55  ;;  %v2669_v19 = vld [vmem:[#allocation4 + $0x570] sm:$0xf0]  ;;  %v2544_v21 = vor.u32 %v3033_v13, %v2541_v14  ;;  %v2997_v23 = vld [vmem:[#allocation4 + $0x344] sm:$0xf]  ;;  %v2956_v11 = vld [vmem:[#allocation4 + $0x1f4] sm:$0xf0] }
  0x59   :  { %1427 = vmatpush.bf16.msra.mxu3 %v2608_v29  ;;  %v2269_v22 = vld [vmem:[#allocation4 + $0x250] sm:$0xf0]  ;;  %v3029_v25 = vld [vmem:[#allocation4 + $0x444] sm:$0xf]  ;;  %v2672_v27 = vor.u32 %v3065_v18, %v2669_v19  ;;  %v2083_v14 = vld [vmem:[#allocation4 + $0xc8] sm:$0xf]  ;;  %v2228_v19 = vor.u32 %v2956_v11, %v2227_v10 }
  0x5a   :  { %1402 = vmatpush.bf16.msra.mxu0 %v2336_v39  ;;  %v2397_v24 = vld [vmem:[#allocation4 + $0x350] sm:$0xf0]  ;;  %v2272_v28 = vor.u32 %v2965_v20, %v2269_v22  ;;  %v3061_v31 = vld [vmem:[#allocation4 + $0x544] sm:$0xf]  ;;  %v2984_v18 = vld [vmem:[#allocation4 + $0x2d4] sm:$0xf0] }
  0x5b   :  { %1415 = vmatpush.bf16.msra.mxu1 %v2464_v40  ;;  %1396 = vmatmul.bf16.vlgmr.msra.gmra.mxu2 %v3290_v7  ;;  %v2525_v26 = vld [vmem:[#allocation4 + $0x450] sm:$0xf0]  ;;  %v2400_v29 = vor.u32 %v2997_v23, %v2397_v24  ;;  %v2961_v33 = vld [vmem:[#allocation4 + $0x224] sm:$0xf]  ;;  %v2467_v20 = vld [vmem:[#allocation4 + $0x3c8] sm:$0xf] }
  0x5c   :  { %1440 = vmatpush.bf16.msrb.mxu2 %v2736_v38  ;;  %v2653_v32 = vld [vmem:[#allocation4 + $0x550] sm:$0xf0]  ;;  %v2528_v34 = vor.u32 %v3029_v25, %v2525_v26  ;;  %v2993_v37 = vld [vmem:[#allocation4 + $0x324] sm:$0xf]  ;;  %v2211_v23 = vld [vmem:[#allocation4 + $0x1c8] sm:$0xf] }
  0x5d   :  { %1428 = vmatpush.bf16.msra.mxu3 %v2592_v44  ;;  %v2253_v36 = vld [vmem:[#allocation4 + $0x230] sm:$0xf0]  ;;  %v3025_v39 = vld [vmem:[#allocation4 + $0x424] sm:$0xf]  ;;  %v2656_v41 = vor.u32 %v3061_v31, %v2653_v32  ;;  %v2952_v24 = vld [vmem:[#allocation4 + $0x1d4] sm:$0xf0] }
  0x5e   :  { %1403 = vmatpush.bf16.msra.mxu0 %v2320_v53  ;;  %v2381_v38 = vld [vmem:[#allocation4 + $0x330] sm:$0xf0]  ;;  %v3057_v42 = vld [vmem:[#allocation4 + $0x524] sm:$0xf]  ;;  %v2256_v46 = vor.u32 %v2961_v33, %v2253_v36  ;;  %v2067_v26 = vld [vmem:[#allocation4 + $0xa8] sm:$0xf]  ;;  %v2212_v32 = vor.u32 %v2952_v24, %v2211_v23 }
  0x5f   :  { %1416 = vmatpush.bf16.msra.mxu1 %v2448_v54  ;;  %v2509_v40 = vld [vmem:[#allocation4 + $0x430] sm:$0xf0]  ;;  %v2957_v44 = vld [vmem:[#allocation4 + $0x204] sm:$0xf]  ;;  %v2384_v47 = vor.u32 %v2993_v37, %v2381_v38  ;;  %v2980_v31 = vld [vmem:[#allocation4 + $0x2b4] sm:$0xf0] }
  0x60   :  { %1441 = vmatpush.bf16.msrb.mxu2 %v2720_v52  ;;  %v2637_v43 = vld [vmem:[#allocation4 + $0x530] sm:$0xf0]  ;;  %v2989_v49 = vld [vmem:[#allocation4 + $0x304] sm:$0xf]  ;;  %v2512_v52 = vor.u32 %v3025_v39, %v2509_v40  ;;  %v2451_v33 = vld [vmem:[#allocation4 + $0x3a8] sm:$0xf] }
  0x61   :  { %1429 = vmatpush.bf16.msra.mxu3 %v2576_v60  ;;  %v2237_v48 = vld [vmem:[#allocation4 + $0x210] sm:$0xf0]  ;;  %v3021_v53 = vld [vmem:[#allocation4 + $0x404] sm:$0xf]  ;;  %v2640_v60 = vor.u32 %v3057_v42, %v2637_v43  ;;  %v2195_v37 = vld [vmem:[#allocation4 + $0x1a8] sm:$0xf] }
  0x62   :  { %1404 = vmatpush.bf16.msra.mxu0 %v2304_v3  ;;  %v2365_v50 = vld [vmem:[#allocation4 + $0x310] sm:$0xf0]  ;;  %v3085_v59 = vld [vmem:[#allocation4 + $0x604] sm:$0xf]  ;;  %v2240_v0 = vor.u32 %v2957_v44, %v2237_v48  ;;  %v2948_v38 = vld [vmem:[#allocation4 + $0x1b4] sm:$0xf0] }
  0x63   :  { %1417 = vmatpush.bf16.msra.mxu1 %v2432_v4  ;;  %v2493_v54 = vld [vmem:[#allocation4 + $0x410] sm:$0xf0]  ;;  %v2368_v1 = vor.u32 %v2989_v49, %v2365_v50  ;;  %v2051_v40 = vld [vmem:[#allocation4 + $0x88] sm:$0xf]  ;;  %v2976_v44 = vld [vmem:[#allocation4 + $0x294] sm:$0xf0] }
  0x64   :  { %1442 = vmatpush.bf16.msrb.mxu2 %v2704_v2  ;;  %v2749_v61 = vld [vmem:[#allocation4 + $0x610] sm:$0xf0]  ;;  %v3053_v2 = vld [vmem:[#allocation4 + $0x504] sm:$0xf]  ;;  %v2496_v4 = vor.u32 %v3021_v53, %v2493_v54  ;;  %v2307_v43 = vld [vmem:[#allocation4 + $0x288] sm:$0xf] }
  0x65   :  { %1430 = vmatpush.bf16.msra.mxu3 %v2560_v9  ;;  %v2621_v3 = vld [vmem:[#allocation4 + $0x510] sm:$0xf0]  ;;  %v2752_v9 = vor.u32 %v3085_v59, %v2749_v61  ;;  %v3008_v48 = vld [vmem:[#allocation4 + $0x394] sm:$0xf0]  ;;  %v2179_v50 = vld [vmem:[#allocation4 + $0x188] sm:$0xf]  ;;  %v2308_v53 = vor.u32 %v2976_v44, %v2307_v43 }
  0x66   :  { %1405 = vmatpush.bf16.msra.mxu0 %v2288_v16  ;;  %v2624_v13 = vor.u32 %v3053_v2, %v2621_v3  ;;  %v2484_v16 = vor.u32 %v3020_v8, %v2483_v6  ;;  %v2035_v54 = vld [vmem:[#allocation4 + $0x68] sm:$0xf]  ;;  %v2908_v56 = vld [vmem:[#allocation4 + $0x74] sm:$0xf0] }
  0x67   :  { %1418 = vmatpush.bf16.msra.mxu1 %v2416_v17  ;;  %v2339_v17 = vld [vmem:[#allocation4 + $0x2c8] sm:$0xf]  ;;  %v3004_v63 = vld [vmem:[#allocation4 + $0x374] sm:$0xf0] }
  0x68   :  { %1443 = vmatpush.bf16.msrb.mxu2 %v2688_v15  ;;  %v2920_v15 = vld [vmem:[#allocation4 + $0xd4] sm:$0xf0]  ;;  %v2340_v25 = vor.u32 %v2984_v18, %v2339_v17  ;;  %v2291_v59 = vld [vmem:[#allocation4 + $0x268] sm:$0xf] }
  0x69   :  { %1431 = vmatpush.bf16.msra.mxu3 %v2544_v21  ;;  %v3016_v21 = vld [vmem:[#allocation4 + $0x3d4] sm:$0xf0]  ;;  %v2084_v22 = vor.u32 %v2920_v15, %v2083_v14  ;;  %v2419_v62 = vld [vmem:[#allocation4 + $0x368] sm:$0xf] }
  0x6a   :  { %1406 = vmatpush.bf16.msra.mxu0 %v2272_v28  ;;  %v2468_v28 = vor.u32 %v3016_v21, %v2467_v20  ;;  %v2940_v2 = vld [vmem:[#allocation4 + $0x174] sm:$0xf0]  ;;  %v2420_v6 = vor.u32 %v3004_v63, %v2419_v62  ;;  %v2275_v8 = vld [vmem:[#allocation4 + $0x248] sm:$0xf] }
  0x6b   :  { %1419 = vmatpush.bf16.msra.mxu1 %v2400_v29  ;;  %v2323_v29 = vld [vmem:[#allocation4 + $0x2a8] sm:$0xf]  ;;  %v2936_v15 = vld [vmem:[#allocation4 + $0x154] sm:$0xf0] }
  0x6c   :  { %1444 = vmatpush.bf16.msrb.mxu2 %v2672_v27  ;;  %v2916_v27 = vld [vmem:[#allocation4 + $0xb4] sm:$0xf0]  ;;  %v2324_v39 = vor.u32 %v2980_v31, %v2323_v29  ;;  %v2403_v11 = vld [vmem:[#allocation4 + $0x348] sm:$0xf] }
  0x6d   :  { %1432 = vmatpush.bf16.msra.mxu3 %v2528_v34  ;;  %v3012_v34 = vld [vmem:[#allocation4 + $0x3b4] sm:$0xf0]  ;;  %v2068_v36 = vor.u32 %v2916_v27, %v2067_v26  ;;  %v2147_v14 = vld [vmem:[#allocation4 + $0x148] sm:$0xf] }
  0x6e   :  { %1407 = vmatpush.bf16.msra.mxu0 %v2256_v46  ;;  %v2452_v42 = vor.u32 %v3012_v34, %v2451_v33  ;;  %v2196_v46 = vor.u32 %v2948_v38, %v2195_v37  ;;  %v2003_v17 = vld [vmem:[#allocation4 + $0x28] sm:$0xf]  ;;  %v2900_v18 = vld [vmem:[#allocation4 + $0x34] sm:$0xf0] }
  0x6f   :  { %1420 = vmatpush.bf16.msra.mxu1 %v2384_v47  ;;  %v2435_v47 = vld [vmem:[#allocation4 + $0x388] sm:$0xf]  ;;  %v2964_v21 = vld [vmem:[#allocation4 + $0x234] sm:$0xf0] }
  0x70   :  { %1445 = vmatpush.bf16.msrb.mxu2 %v2656_v41  ;;  %v2912_v41 = vld [vmem:[#allocation4 + $0x94] sm:$0xf0]  ;;  %v2436_v58 = vor.u32 %v3008_v48, %v2435_v47  ;;  %v2259_v20 = vld [vmem:[#allocation4 + $0x228] sm:$0xf]  ;;  %v2922_v47 = vld [vmem:[#allocation4 + $0xec] sm:$0xf] }
  0x71   :  { %1433 = vmatpush.bf16.msra.mxu3 %v2512_v52  ;;  %v2052_v49 = vor.u32 %v2912_v41, %v2051_v40  ;;  %v2944_v52 = vld [vmem:[#allocation4 + $0x194] sm:$0xf0]  ;;  %v2387_v23 = vld [vmem:[#allocation4 + $0x328] sm:$0xf]  ;;  %v2260_v29 = vor.u32 %v2964_v21, %v2259_v20  ;;  %v2101_v48 = vld [vmem:[#allocation4 + $0xf8] sm:$0xf0] }
  0x72   :  { %1408 = vmatpush.bf16.msra.mxu0 %v2240_v0  ;;  %v2180_v61 = vor.u32 %v2944_v52, %v2179_v50  ;;  %v2036_v0 = vor.u32 %v2908_v56, %v2035_v54  ;;  %v2996_v24 = vld [vmem:[#allocation4 + $0x334] sm:$0xf0]  ;;  %v2131_v26 = vld [vmem:[#allocation4 + $0x128] sm:$0xf]  ;;  %v2104_v63 = vor.u32 %v2922_v47, %v2101_v48 }
  0x73   :  { %1421 = vmatpush.bf16.msra.mxu1 %v2368_v1  ;;  %v2163_v1 = vld [vmem:[#allocation4 + $0x168] sm:$0xf]  ;;  %v2932_v27 = vld [vmem:[#allocation4 + $0x134] sm:$0xf0]  ;;  %v2388_v34 = vor.u32 %v2996_v24, %v2387_v23  ;;  %v2197_v23 = vld [vmem:[#allocation4 + $0x1b8] sm:$0xf0] }
  0x74   :  { %1446 = vmatpush.bf16.msrb.mxu2 %v2640_v60  ;;  %v2972_v60 = vld [vmem:[#allocation4 + $0x274] sm:$0xf0]  ;;  %v2164_v10 = vor.u32 %v2940_v2, %v2163_v1  ;;  %v2243_v37 = vld [vmem:[#allocation4 + $0x208] sm:$0xf]  ;;  %v2132_v40 = vor.u32 %v2932_v27, %v2131_v26  ;;  %v2918_v1 = vld [vmem:[#allocation4 + $0xcc] sm:$0xf] }
  0x75   :  { %1434 = vmatpush.bf16.msra.mxu3 %v2496_v4  ;;  %1409 = vmatmul.bf16.vlgmr.msra.gmra.mxu0 %v3282_v51  ;;  %v2292_v3 = vor.u32 %v2972_v60, %v2291_v59  ;;  %v2019_v4 = vld [vmem:[#allocation4 + $0x48] sm:$0xf]  ;;  %v2896_v31 = vld [vmem:[#allocation4 + $0x14] sm:$0xf0]  ;;  %v2954_v60 = vld [vmem:[#allocation4 + $0x1ec] sm:$0xf] }
  0x76   :  { %1492 = vmatpush.bf16.msrb.mxu0 %v2356_v12  ;;  %1422 = vmatmul.bf16.vlgmr.msra.gmra.mxu1 %v3286_v57  ;;  %v3000_v12 = vld [vmem:[#allocation4 + $0x354] sm:$0xf0]  ;;  %v2739_v52 = vld [vmem:[#allocation4 + $0x5e8] sm:$0xf]  ;;  %v2085_v2 = vld [vmem:[#allocation4 + $0xd8] sm:$0xf0] }
  0x77   :  { %1466 = vmatpush.bf16.msrb.mxu1 %v2100_v5  ;;  %v2904_v5 = vld [vmem:[#allocation4 + $0x54] sm:$0xf0]  ;;  %v2595_v54 = vld [vmem:[#allocation4 + $0x4c8] sm:$0xf]  ;;  %v2910_v26 = vld [vmem:[#allocation4 + $0x8c] sm:$0xf] }
  0x78   :  { %1447 = vmatpush.bf16.msrb.mxu2 %v2624_v13  ;;  %1435 = vmatmul.bf16.vlgmr.msra.gmra.mxu3 %v3298_v30  ;;  %v2020_v13 = vor.u32 %v2904_v5, %v2019_v4  ;;  %v3052_v33 = vld [vmem:[#allocation4 + $0x4f4] sm:$0xf0]  ;;  %v2723_v5 = vld [vmem:[#allocation4 + $0x5c8] sm:$0xf]  ;;  %v2053_v27 = vld [vmem:[#allocation4 + $0x98] sm:$0xf0] }
  0x79   :  { %1460 = vmatpush.bf16.msrb.mxu3 %v2752_v9  ;;  %v2968_v9 = vld [vmem:[#allocation4 + $0x254] sm:$0xf0]  ;;  %v2563_v20 = vld [vmem:[#allocation4 + $0x488] sm:$0xf] }
  0x7a   :  { %1493 = vmatpush.bf16.msrb.mxu0 %v2340_v25  ;;  %v2004_v25 = vor.u32 %v2900_v18, %v2003_v17  ;;  %v2960_v38 = vld [vmem:[#allocation4 + $0x214] sm:$0xf0]  ;;  %v2707_v18 = vld [vmem:[#allocation4 + $0x5a8] sm:$0xf] }
  0x7b   :  { %1467 = vmatpush.bf16.msrb.mxu1 %v2084_v22  ;;  %1448 = vmatmul.bf16.vlgmr.msrb.gmra.mxu2 %v3300_v35  ;;  %v2148_v22 = vor.u32 %v2936_v15, %v2147_v14  ;;  %v2992_v41 = vld [vmem:[#allocation4 + $0x314] sm:$0xf0]  ;;  %v2244_v50 = vor.u32 %v2960_v38, %v2243_v37  ;;  %v2914_v14 = vld [vmem:[#allocation4 + $0xac] sm:$0xf]  ;;  %v2069_v15 = vld [vmem:[#allocation4 + $0xb8] sm:$0xf0]  ;;  %v2056_v38 = vor.u32 %v2910_v26, %v2053_v27 }
  0x7c   :  { %1505 = vmatpush.bf16.msra.mxu2 %v2484_v16  ;;  %v2276_v16 = vor.u32 %v2968_v9, %v2275_v8  ;;  %v3088_v43 = vld [vmem:[#allocation4 + $0x614] sm:$0xf0]  ;;  %v2579_v8 = vld [vmem:[#allocation4 + $0x4a8] sm:$0xf]  ;;  %v2072_v24 = vor.u32 %v2914_v14, %v2069_v15  ;;  %v2181_v37 = vld [vmem:[#allocation4 + $0x198] sm:$0xf0] }
  0x7d   :  { %1479 = vmatpush.bf16.msra.mxu3 %v2228_v19  ;;  %v2404_v19 = vor.u32 %v3000_v12, %v2403_v11  ;;  %v3044_v9 = vld [vmem:[#allocation4 + $0x4b4] sm:$0xf0]  ;;  %v2213_v11 = vld [vmem:[#allocation4 + $0x1d8] sm:$0xf0]  ;;  %v2088_v12 = vor.u32 %v2918_v1, %v2085_v2  ;;  %v2531_v47 = vld [vmem:[#allocation4 + $0x448] sm:$0xf] }
  0x7e   :  { %1494 = vmatpush.bf16.msrb.mxu0 %v2324_v39  ;;  %v2371_v39 = vld [vmem:[#allocation4 + $0x308] sm:$0xf]  ;;  %v3040_v21 = vld [vmem:[#allocation4 + $0x494] sm:$0xf0]  ;;  %v2149_v1 = vld [vmem:[#allocation4 + $0x158] sm:$0xf0] }
  0x7f   :  { %1468 = vmatpush.bf16.msrb.mxu1 %v2068_v36  ;;  %v2115_v36 = vld [vmem:[#allocation4 + $0x108] sm:$0xf]  ;;  %v2372_v56 = vor.u32 %v2992_v41, %v2371_v39  ;;  %v2037_v41 = vld [vmem:[#allocation4 + $0x78] sm:$0xf0]  ;;  %v3032_v48 = vld [vmem:[#allocation4 + $0x454] sm:$0xf0] }
  0x80   :  { %1506 = vmatpush.bf16.msra.mxu2 %v2468_v28  ;;  %v1987_v28 = vld [vmem:[#allocation4 + $0x8] sm:$0xf]  ;;  %v2133_v14 = vld [vmem:[#allocation4 + $0x138] sm:$0xf0] }
  0x81   :  { %1480 = vmatpush.bf16.msra.mxu3 %v2212_v32  ;;  %v2611_v32 = vld [vmem:[#allocation4 + $0x4e8] sm:$0xf]  ;;  %v1988_v44 = vor.u32 %v2896_v31, %v1987_v28  ;;  %v2564_v28 = vor.u32 %v3040_v21, %v2563_v20  ;;  %v2894_v20 = vld [vmem:[#allocation4 + $0xc] sm:$0xf]  ;;  %v1989_v21 = vld [vmem:[#allocation4 + $0x18] sm:$0xf0] }
  0x82   :  { %1495 = vmatpush.bf16.msrb.mxu0 %v2308_v53  ;;  %v3084_v53 = vld [vmem:[#allocation4 + $0x5f4] sm:$0xf0]  ;;  %v2691_v31 = vld [vmem:[#allocation4 + $0x588] sm:$0xf]  ;;  %v2485_v26 = vld [vmem:[#allocation4 + $0x3f8] sm:$0xf0] }
  0x83   :  { %1469 = vmatpush.bf16.msrb.mxu1 %v2052_v49  ;;  %v2612_v49 = vor.u32 %v3052_v33, %v2611_v32  ;;  %v3072_v32 = vld [vmem:[#allocation4 + $0x594] sm:$0xf0]  ;;  %v2547_v33 = vld [vmem:[#allocation4 + $0x468] sm:$0xf] }
  0x84   :  { %1507 = vmatpush.bf16.msra.mxu2 %v2452_v42  ;;  %v2755_v42 = vld [vmem:[#allocation4 + $0x608] sm:$0xf]  ;;  %v2692_v39 = vor.u32 %v3072_v32, %v2691_v31  ;;  %v2982_v31 = vld [vmem:[#allocation4 + $0x2cc] sm:$0xf]  ;;  %v1992_v32 = vor.u32 %v2894_v20, %v1989_v21 }
  0x85   :  { %1481 = vmatpush.bf16.msra.mxu3 %v2196_v46  ;;  %v2928_v46 = vld [vmem:[#allocation4 + $0x114] sm:$0xf0]  ;;  %v2756_v59 = vor.u32 %v3088_v43, %v2755_v42  ;;  %v3002_v20 = vld [vmem:[#allocation4 + $0x36c] sm:$0xf] }
  0x86   :  { %1496 = vmatpush.bf16.msrb.mxu0 %v2292_v3  ;;  %v2116_v62 = vor.u32 %v2928_v46, %v2115_v36  ;;  %v2942_v36 = vld [vmem:[#allocation4 + $0x18c] sm:$0xf]  ;;  %v3068_v46 = vld [vmem:[#allocation4 + $0x574] sm:$0xf0] }
  0x87   :  { %1470 = vmatpush.bf16.msrb.mxu1 %v2036_v0  ;;  %v2740_v0 = vor.u32 %v3084_v53, %v2739_v52  ;;  %v2184_v43 = vor.u32 %v2942_v36, %v2181_v37  ;;  %v2117_v36 = vld [vmem:[#allocation4 + $0x118] sm:$0xf0] }
  0x88   :  { %1508 = vmatpush.bf16.msra.mxu2 %v2436_v58  ;;  %2762 = vmatmul.msk.bf16.vlgmr.msrb.gmra.mxu3 %vm1280_vm0, %v3294_v45  ;;  %v3048_v58 = vld [vmem:[#allocation4 + $0x4d4] sm:$0xf0] }
  0x89   :  { %1482 = vmatpush.bf16.msra.mxu3 %v2180_v61  ;;  %v2229_v61 = vld [vmem:[#allocation4 + $0x1f8] sm:$0xf0]  ;;  %v2596_v3 = vor.u32 %v3048_v58, %v2595_v54  ;;  %v2902_v54 = vld [vmem:[#allocation4 + $0x4c] sm:$0xf]  ;;  %v2532_v58 = vor.u32 %v3032_v48, %v2531_v47 }
  0x8a   :  { %1497 = vmatpush.bf16.msrb.mxu0 %v2276_v16  ;;  %v2232_v4 = vor.u32 %v2954_v60, %v2229_v61  ;;  %v2580_v16 = vor.u32 %v3044_v9, %v2579_v8  ;;  %v2659_v60 = vld [vmem:[#allocation4 + $0x548] sm:$0xf]  ;;  %v3064_v61 = vld [vmem:[#allocation4 + $0x554] sm:$0xf0]  ;;  %v3046_v47 = vld [vmem:[#allocation4 + $0x4cc] sm:$0xf] }
  0x8b   :  { %1471 = vmatpush.bf16.msrb.mxu1 %v2020_v13  ;;  %v2643_v9 = vld [vmem:[#allocation4 + $0x528] sm:$0xf]  ;;  %v2597_v48 = vld [vmem:[#allocation4 + $0x4d8] sm:$0xf0] }
  0x8c   :  { %1509 = vmatpush.bf16.msra.mxu2 %v2420_v6  ;;  %v3080_v6 = vld [vmem:[#allocation4 + $0x5d4] sm:$0xf0] }
  0x8d   :  { %1483 = vmatpush.bf16.msra.mxu3 %v2164_v10  ;;  %v2950_v10 = vld [vmem:[#allocation4 + $0x1cc] sm:$0xf]  ;;  %v2724_v13 = vor.u32 %v3080_v6, %v2723_v5  ;;  %v2005_v5 = vld [vmem:[#allocation4 + $0x38] sm:$0xf0] }
  0x8e   :  { %1498 = vmatpush.bf16.msrb.mxu0 %v2260_v29  ;;  %v2216_v17 = vor.u32 %v2950_v10, %v2213_v11  ;;  %v3060_v10 = vld [vmem:[#allocation4 + $0x534] sm:$0xf0]  ;;  %v2499_v11 = vld [vmem:[#allocation4 + $0x408] sm:$0xf] }
  0x8f   :  { %1472 = vmatpush.bf16.msrb.mxu1 %v2004_v25 }
  0x90   :  { %1510 = vmatpush.bf16.msra.mxu2 %v2404_v19  ;;  %v3076_v19 = vld [vmem:[#allocation4 + $0x5b4] sm:$0xf0] }
  0x91   :  { %1484 = vmatpush.bf16.msra.mxu3 %v2148_v22  ;;  %v2946_v22 = vld [vmem:[#allocation4 + $0x1ac] sm:$0xf]  ;;  %v2708_v25 = vor.u32 %v3076_v19, %v2707_v18  ;;  %v2644_v18 = vor.u32 %v3060_v10, %v2643_v9  ;;  %v2627_v19 = vld [vmem:[#allocation4 + $0x508] sm:$0xf]  ;;  %v2437_v10 = vld [vmem:[#allocation4 + $0x398] sm:$0xf0] }
  0x92   :  { %1499 = vmatpush.bf16.msrb.mxu0 %v2244_v50  ;;  %v2200_v29 = vor.u32 %v2946_v22, %v2197_v23  ;;  %v2165_v50 = vld [vmem:[#allocation4 + $0x178] sm:$0xf0] }
  0x93   :  { %1473 = vmatpush.bf16.msrb.mxu1 %v1988_v44  ;;  %v2675_v44 = vld [vmem:[#allocation4 + $0x568] sm:$0xf] }
  0x94   :  { %1511 = vmatpush.bf16.msra.mxu2 %v2388_v34  ;;  %v3036_v34 = vld [vmem:[#allocation4 + $0x474] sm:$0xf0]  ;;  %v2676_v53 = vor.u32 %v3068_v46, %v2675_v44  ;;  %v2469_v46 = vld [vmem:[#allocation4 + $0x3d8] sm:$0xf0] }
  0x95   :  { %1485 = vmatpush.bf16.msra.mxu3 %v2132_v40  ;;  %1500 = vmatmul.bf16.vlgmr.msrb.gmra.mxu0 %v3282_v51  ;;  %v2906_v40 = vld [vmem:[#allocation4 + $0x6c] sm:$0xf]  ;;  %v2548_v42 = vor.u32 %v3036_v34, %v2547_v33  ;;  %v2341_v33 = vld [vmem:[#allocation4 + $0x2d8] sm:$0xf0] }
  0x96   :  { %1551 = vmatpush.bf16.msra.mxu0 %v2756_v59  ;;  %1474 = vmatmul.bf16.vlgmr.msrb.gmra.mxu1 %v3284_v55  ;;  %v2040_v52 = vor.u32 %v2906_v40, %v2037_v41  ;;  %v2926_v34 = vld [vmem:[#allocation4 + $0x10c] sm:$0xf] }
  0x97   :  { %1518 = vmatpush.bf16.msra.mxu1 %v2612_v49  ;;  %v2938_v49 = vld [vmem:[#allocation4 + $0x16c] sm:$0xf]  ;;  %v2120_v44 = vor.u32 %v2926_v34, %v2117_v36 }
  0x98   :  { %1512 = vmatpush.bf16.msra.mxu2 %v2372_v56  ;;  %v2021_v56 = vld [vmem:[#allocation4 + $0x58] sm:$0xf0]  ;;  %v2168_v59 = vor.u32 %v2938_v49, %v2165_v50  ;;  %v2978_v50 = vld [vmem:[#allocation4 + $0x2ac] sm:$0xf] }
  0x99   :  { %1486 = vmatpush.bf16.msra.mxu3 %v2116_v62  ;;  %v2515_v62 = vld [vmem:[#allocation4 + $0x428] sm:$0xf]  ;;  %v2024_v2 = vor.u32 %v2902_v54, %v2021_v56  ;;  %v2725_v54 = vld [vmem:[#allocation4 + $0x5d8] sm:$0xf0]  ;;  %v2998_v34 = vld [vmem:[#allocation4 + $0x34c] sm:$0xf] }
  0x9a   :  { %1570 = vmatpush.bf16.msrb.mxu0 %v2232_v4  ;;  %v2898_v4 = vld [vmem:[#allocation4 + $0x2c] sm:$0xf] }
  0x9b   :  { %1519 = vmatpush.bf16.msra.mxu1 %v2596_v3  ;;  %1513 = vmatmul.bf16.vlgmr.msra.gmra.mxu2 %v3286_v57  ;;  %v2660_v3 = vor.u32 %v3064_v61, %v2659_v60  ;;  %v2008_v15 = vor.u32 %v2898_v4, %v2005_v5  ;;  %v2453_v61 = vld [vmem:[#allocation4 + $0x3b8] sm:$0xf0] }
  0x9c   :  { %1557 = vmatpush.bf16.msrb.mxu2 %v2104_v63  ;;  %1487 = vmatmul.bf16.vlgmr.msra.gmra.mxu3 %v3290_v7  ;;  %v3028_v63 = vld [vmem:[#allocation4 + $0x434] sm:$0xf0]  ;;  %v2709_v4 = vld [vmem:[#allocation4 + $0x5b8] sm:$0xf0] }
  0x9d   :  { %1531 = vmatpush.bf16.msrb.mxu3 %v2740_v0  ;;  %v2934_v0 = vld [vmem:[#allocation4 + $0x14c] sm:$0xf]  ;;  %v2516_v6 = vor.u32 %v3028_v63, %v2515_v62  ;;  %v2581_v63 = vld [vmem:[#allocation4 + $0x4b8] sm:$0xf0] }
  0x9e   :  { %1571 = vmatpush.bf16.msrb.mxu0 %v2216_v17  ;;  %v2152_v8 = vor.u32 %v2934_v0, %v2149_v1  ;;  %v2357_v17 = vld [vmem:[#allocation4 + $0x2f8] sm:$0xf0]  ;;  %v3042_v62 = vld [vmem:[#allocation4 + $0x4ac] sm:$0xf] }
  0x9f   :  { %1520 = vmatpush.bf16.msra.mxu1 %v2580_v16  ;;  %v2986_v16 = vld [vmem:[#allocation4 + $0x2ec] sm:$0xf] }
  0xa0   :  { %1558 = vmatpush.bf16.msrb.mxu2 %v2088_v12  ;;  %v3024_v12 = vld [vmem:[#allocation4 + $0x414] sm:$0xf0]  ;;  %v2360_v27 = vor.u32 %v2986_v16, %v2357_v17  ;;  %v2974_v1 = vld [vmem:[#allocation4 + $0x28c] sm:$0xf]  ;;  %v2693_v17 = vld [vmem:[#allocation4 + $0x598] sm:$0xf0] }
  0xa1   :  { %1532 = vmatpush.bf16.msrb.mxu3 %v2724_v13  ;;  %v2930_v13 = vld [vmem:[#allocation4 + $0x12c] sm:$0xf]  ;;  %v2500_v22 = vor.u32 %v3024_v12, %v2499_v11  ;;  %v2565_v12 = vld [vmem:[#allocation4 + $0x498] sm:$0xf0] }
  0xa2   :  { %1572 = vmatpush.bf16.msrb.mxu0 %v2200_v29  ;;  %v2136_v23 = vor.u32 %v2930_v13, %v2133_v14  ;;  %v2613_v29 = vld [vmem:[#allocation4 + $0x4f8] sm:$0xf0]  ;;  %v3038_v11 = vld [vmem:[#allocation4 + $0x48c] sm:$0xf] }
  0xa3   :  { %1521 = vmatpush.bf16.msra.mxu1 %v2564_v28  ;;  %v3050_v28 = vld [vmem:[#allocation4 + $0x4ec] sm:$0xf] }
  0xa4   :  { %1559 = vmatpush.bf16.msrb.mxu2 %v2072_v24  ;;  %v3056_v24 = vld [vmem:[#allocation4 + $0x514] sm:$0xf0]  ;;  %v2616_v41 = vor.u32 %v3050_v28, %v2613_v29  ;;  %v2970_v14 = vld [vmem:[#allocation4 + $0x26c] sm:$0xf]  ;;  %v2677_v29 = vld [vmem:[#allocation4 + $0x578] sm:$0xf0] }
  0xa5   :  { %1533 = vmatpush.bf16.msrb.mxu3 %v2708_v25  ;;  %2763 = vmatmul.msk.bf16.vlgmr.msra.gmra.mxu0 %vm1280_vm0, %v3294_v45  ;;  %v3018_v25 = vld [vmem:[#allocation4 + $0x3ec] sm:$0xf]  ;;  %v2628_v37 = vor.u32 %v3056_v24, %v2627_v19  ;;  %v2568_v19 = vor.u32 %v3038_v11, %v2565_v12  ;;  %v2549_v24 = vld [vmem:[#allocation4 + $0x478] sm:$0xf0] }
  0xa6   :  { %1573 = vmatpush.bf16.msrb.mxu0 %v2184_v43  ;;  %v2488_v40 = vor.u32 %v3018_v25, %v2485_v26  ;;  %v2344_v43 = vor.u32 %v2982_v31, %v2341_v33  ;;  %v2966_v26 = vld [vmem:[#allocation4 + $0x24c] sm:$0xf] }
  0xa7   :  { %1522 = vmatpush.bf16.msra.mxu1 %v2548_v42  ;;  %v3014_v42 = vld [vmem:[#allocation4 + $0x3cc] sm:$0xf] }
  0xa8   :  { %1560 = vmatpush.bf16.msrb.mxu2 %v2056_v38  ;;  %v3082_v38 = vld [vmem:[#allocation4 + $0x5ec] sm:$0xf]  ;;  %v2472_v56 = vor.u32 %v3014_v42, %v2469_v46 }
  0xa9   :  { %1534 = vmatpush.bf16.msrb.mxu3 %v2692_v39  ;;  %v2741_v39 = vld [vmem:[#allocation4 + $0x5f8] sm:$0xf0]  ;;  %v3066_v28 = vld [vmem:[#allocation4 + $0x56c] sm:$0xf] }
  0xaa   :  { %1574 = vmatpush.bf16.msrb.mxu0 %v2168_v59  ;;  %v2744_v49 = vor.u32 %v3082_v38, %v2741_v39  ;;  %v3010_v59 = vld [vmem:[#allocation4 + $0x3ac] sm:$0xf]  ;;  %v2405_v38 = vld [vmem:[#allocation4 + $0x358] sm:$0xf0] }
  0xab   :  { %1523 = vmatpush.bf16.msra.mxu1 %v2532_v58  ;;  %v2600_v58 = vor.u32 %v3046_v47, %v2597_v48  ;;  %v2456_v5 = vor.u32 %v3010_v59, %v2453_v61  ;;  %v3030_v39 = vld [vmem:[#allocation4 + $0x44c] sm:$0xf]  ;;  %v2661_v47 = vld [vmem:[#allocation4 + $0x558] sm:$0xf0]  ;;  %v2408_v48 = vor.u32 %v2998_v34, %v2405_v38 }
  0xac   :  { %1561 = vmatpush.bf16.msrb.mxu2 %v2040_v52  ;;  %v2325_v52 = vld [vmem:[#allocation4 + $0x2b8] sm:$0xf0]  ;;  %v2962_v42 = vld [vmem:[#allocation4 + $0x22c] sm:$0xf] }
  0xad   :  { %1535 = vmatpush.bf16.msrb.mxu3 %v2676_v53  ;;  %v3078_v53 = vld [vmem:[#allocation4 + $0x5cc] sm:$0xf]  ;;  %v2328_v60 = vor.u32 %v2978_v50, %v2325_v52 }
  0xae   :  { %1575 = vmatpush.bf16.msrb.mxu0 %v2152_v8  ;;  %v2728_v0 = vor.u32 %v3078_v53, %v2725_v54  ;;  %v3006_v8 = vld [vmem:[#allocation4 + $0x38c] sm:$0xf]  ;;  %v2389_v53 = vld [vmem:[#allocation4 + $0x338] sm:$0xf0] }
  0xaf   :  { %1524 = vmatpush.bf16.msra.mxu1 %v2516_v6  ;;  %v2584_v6 = vor.u32 %v3042_v62, %v2581_v63  ;;  %v3062_v46 = vld [vmem:[#allocation4 + $0x54c] sm:$0xf]  ;;  %v2645_v63 = vld [vmem:[#allocation4 + $0x538] sm:$0xf0] }
  0xb0   :  { %1562 = vmatpush.bf16.msrb.mxu2 %v2024_v2  ;;  %v2309_v2 = vld [vmem:[#allocation4 + $0x298] sm:$0xf0]  ;;  %v2994_v50 = vld [vmem:[#allocation4 + $0x32c] sm:$0xf] }
  0xb1   :  { %1536 = vmatpush.bf16.msrb.mxu3 %v2660_v3  ;;  %v3074_v3 = vld [vmem:[#allocation4 + $0x5ac] sm:$0xf]  ;;  %v2312_v9 = vor.u32 %v2974_v1, %v2309_v2  ;;  %v2757_v1 = vld [vmem:[#allocation4 + $0x618] sm:$0xf0] }
  0xb2   :  { %1576 = vmatpush.bf16.msrb.mxu0 %v2136_v23  ;;  %v2712_v13 = vor.u32 %v3074_v3, %v2709_v4  ;;  %v3322_v16 = vpop.f32.mrf.mxu0  ;;  %v3034_v23 = vld [vmem:[#allocation4 + $0x46c] sm:$0xf]  ;;  %v2392_v3 = vor.u32 %v2994_v50, %v2389_v53 }
  0xb3   :  { %1525 = vmatpush.bf16.msra.mxu1 %v2500_v22  ;;  %v2421_v22 = vld [vmem:[#allocation4 + $0x378] sm:$0xf0]  ;;  %v2552_v33 = vor.u32 %v3034_v23, %v2549_v24  ;;  %v3026_v54 = vld [vmem:[#allocation4 + $0x42c] sm:$0xf] }
  0xb4   :  { %1563 = vmatpush.bf16.msrb.mxu2 %v2008_v15  ;;  %v2293_v15 = vld [vmem:[#allocation4 + $0x278] sm:$0xf0]  ;;  %v2958_v59 = vld [vmem:[#allocation4 + $0x20c] sm:$0xf] }
  0xb5   :  { %1537 = vmatpush.bf16.msrb.mxu3 %v2644_v18  ;;  %v2440_v18 = vor.u32 %v3006_v8, %v2437_v10  ;;  %v2296_v21 = vor.u32 %v2970_v14, %v2293_v15  ;;  %v3058_v61 = vld [vmem:[#allocation4 + $0x52c] sm:$0xf]  ;;  %v3104_v24 = vld [vmem:[#allocation7 + $0x78] sm:$0xff] }
  0xb6   :  { %1526 = vmatmul.bf16.vlgmr.msra.gmra.mxu1 %v3298_v30  ;;  %1577 = vmatpush.bf16.msrb.mxu0 %v2120_v44  ;;  %v2990_v8 = vld [vmem:[#allocation4 + $0x30c] sm:$0xf]  ;;  %v2648_v11 = vor.u32 %v3058_v61, %v2645_v63 }
  0xb7   :  { %1583 = vmatpush.bf16.msrb.mxu1 %v2360_v27  ;;  %v2277_v27 = vld [vmem:[#allocation4 + $0x258] sm:$0xf0]  ;;  %v3022_v12 = vld [vmem:[#allocation4 + $0x40c] sm:$0xf] }
  0xb8   :  { %1564 = vmatpush.bf16.msrb.mxu2 %v1992_v32  ;;  %v2424_v32 = vor.u32 %v3002_v20, %v2421_v22  ;;  %v2280_v36 = vor.u32 %v2966_v26, %v2277_v27  ;;  %v3054_v15 = vld [vmem:[#allocation4 + $0x50c] sm:$0xf]  ;;  %v3096_v20 = vld [vmem:[#allocation7 + $0x38] sm:$0xff] }
  0xb9   :  { %1538 = vmatpush.bf16.msrb.mxu3 %v2628_v37  ;;  %1578 = vmatmul.bf16.vlgmr.msrb.gmra.mxu0 %v3290_v7  ;;  %v3324_v25 = vpop.f32.mrf.mxu1  ;;  %v3102_v34 = vld [vmem:[#allocation7 + $0x68] sm:$0xff] }
  0xba   :  { %1622 = vmatpush.bf16.msra.mxu0 %v2744_v49  ;;  %v3326_v31 = vpop.f32.mrf.mxu2  ;;  %v1295_v44 = vpop.f32.mrf.mxu0  ;;  %v3098_v50 = vld [vmem:[#allocation7 + $0x48] sm:$0xff] }
  0xbb   :  { %1584 = vmatpush.bf16.msrb.mxu1 %v2344_v43  ;;  %1565 = vmatmul.bf16.vlgmr.msrb.gmra.mxu2 %v3284_v55  ;;  %v3070_v55 = vld [vmem:[#allocation4 + $0x58c] sm:$0xf]  ;;  %v2261_v43 = vld [vmem:[#allocation4 + $0x238] sm:$0xf0] }
  0xbc   :  { %1609 = vmatpush.bf16.msra.mxu2 %v2616_v41  ;;  %1539 = vmatmul.bf16.vlgmr.msrb.gmra.mxu3 %v3300_v35  ;;  %v2696_v7 = vor.u32 %v3070_v55, %v2693_v17  ;;  %v2680_v41 = vor.u32 %v3066_v28, %v2677_v29  ;;  %v2264_v52 = vor.u32 %v2962_v42, %v2261_v43  ;;  %v2629_v55 = vld [vmem:[#allocation4 + $0x518] sm:$0xf0]  ;;  %v3090_v43 = vld [vmem:[#allocation7 + $0x8] sm:$0xff] }
  0xbd   :  { %1596 = vmatpush.bf16.msra.mxu3 %v2488_v40  ;;  %v3328_v37 = vpop.f32.mrf.mxu3  ;;  %v2533_v40 = vld [vmem:[#allocation4 + $0x458] sm:$0xf0] }
  0xbe   :  { %1623 = vmatpush.bf16.msra.mxu0 %v2728_v0  ;;  %v2536_v49 = vor.u32 %v3030_v39, %v2533_v40  ;;  %v3086_v0 = vld [vmem:[#allocation4 + $0x60c] sm:$0xf]  ;;  %v3100_v42 = vld [vmem:[#allocation7 + $0x58] sm:$0xff] }
  0xbf   :  { %1585 = vmatpush.bf16.msrb.mxu1 %v2328_v60  ;;  %v2245_v60 = vld [vmem:[#allocation4 + $0x218] sm:$0xf0]  ;;  %v2760_v14 = vor.u32 %v3086_v0, %v2757_v1 }
  0xc0   :  { %1610 = vmatpush.bf16.msra.mxu2 %v2600_v58  ;;  %v2664_v58 = vor.u32 %v3062_v46, %v2661_v47  ;;  %v3089_v47 = vld [vmem:[#allocation7] sm:$0xff]  ;;  %v3112_v1 = vld [vmem:[#allocation7 + $0xb8] sm:$0xff] }
  0xc1   :  { %1597 = vmatpush.bf16.msra.mxu3 %v2472_v56  ;;  %v2517_v56 = vld [vmem:[#allocation4 + $0x438] sm:$0xf0]  ;;  %v1308_v62 = vpop.f32.mrf.mxu1 }
  0xc2   :  { %1624 = vmatpush.bf16.msra.mxu0 %v2712_v13  ;;  %v1321_v2 = vpop.f32.mrf.mxu2  ;;  %v2520_v4 = vor.u32 %v3026_v54, %v2517_v56  ;;  %v2501_v13 = vld [vmem:[#allocation4 + $0x418] sm:$0xf0] }
  0xc3   :  { %1586 = vmatpush.bf16.msrb.mxu1 %v2312_v9  ;;  %v2373_v9 = vld [vmem:[#allocation4 + $0x318] sm:$0xf0]  ;;  %v3111_v2 = vld [vmem:[#allocation7 + $0xb0] sm:$0xff] }
  0xc4   :  { %1611 = vmatpush.bf16.msra.mxu2 %v2584_v6  ;;  %v2248_v6 = vor.u32 %v2958_v59, %v2245_v60 }
  0xc5   :  { %1598 = vmatpush.bf16.msra.mxu3 %v2456_v5  ;;  %v3330_v5 = vld [vmem:[#allocation6] sm:$0xf]  ;;  %v1334_v10 = vpop.f32.mrf.mxu3 }
  0xc6   :  { %1625 = vmatpush.bf16.msra.mxu0 %v2696_v7  ;;  %v292_v17 = vperm.slane %v3330_v5, 0  ;;  %v3095_v7 = vld [vmem:[#allocation7 + $0x30] sm:$0xff]  ;;  %v293_v54 = vperm.slane %v3330_v5, 1 }
  0xc7   :  { %1587 = vmatpush.bf16.msrb.mxu1 %v2296_v21  ;;  %v2632_v21 = vor.u32 %v3054_v15, %v2629_v55  ;;  %v3108_v55 = vld [vmem:[#allocation7 + $0x98] sm:$0xff] }
  0xc8   :  { %1612 = vmatpush.bf16.msra.mxu2 %v2568_v19  ;;  %v2504_v19 = vor.u32 %v3022_v12, %v2501_v13  ;;  %v1294_v22 = vadd.f32 %v3322_v16, %v292_v17  ;;  %v3094_v16 = vld [vmem:[#allocation7 + $0x28] sm:$0xff]  ;;  %v3107_v17 = vld [vmem:[#allocation7 + $0x90] sm:$0xff] }
  0xc9   :  { %1599 = vmatpush.bf16.msra.mxu3 %v2440_v18  ;;  %v2376_v18 = vor.u32 %v2990_v8, %v2373_v9  ;;  %v3110_v9 = vld [vmem:[#allocation7 + $0xa8] sm:$0xff] }
  0xca   :  { %1626 = vmatpush.bf16.msra.mxu0 %v2680_v41  ;;  %v1371_v23 = vpop.f32.mrf.mxu2  ;;  %v1307_v26 = vadd.f32 %v3324_v25, %v1294_v22  ;;  %v3092_v25 = vld [vmem:[#allocation7 + $0x18] sm:$0xff] }
  0xcb   :  { %1588 = vmatpush.bf16.msrb.mxu1 %v2280_v36 }
  0xcc   :  { %1613 = vmatpush.bf16.msra.mxu2 %v2552_v33  ;;  %v1320_v28 = vadd.f32 %v3326_v31, %v1307_v26  ;;  %v3093_v33 = vld [vmem:[#allocation7 + $0x20] sm:$0xff]  ;;  %v3091_v31 = vld [vmem:[#allocation7 + $0x10] sm:$0xff] }
  0xcd   :  { %1600 = vmatpush.bf16.msra.mxu3 %v2424_v32  ;;  %v3105_v26 = vld [vmem:[#allocation7 + $0x80] sm:$0xff] }
  0xce   :  { %1627 = vmatpush.bf16.msra.mxu0 %v2664_v58 }
  0xcf   :  { %1589 = vmatpush.bf16.msrb.mxu1 %v2264_v52  ;;  %v3097_v52 = vld [vmem:[#allocation7 + $0x40] sm:$0xff] }
  0xd0   :  { %1614 = vmatpush.bf16.msra.mxu2 %v2536_v49 }
  0xd1   :  { %1601 = vmatpush.bf16.msra.mxu3 %v2408_v48 }
  0xd2   :  { %1628 = vmatpush.bf16.msra.mxu0 %v2648_v11  ;;  %v1345_v27 = vpop.f32.mrf.mxu0  ;;  %v1373_v32 = vpop.f32.mrf.mxu2  ;;  %v3109_v11 = vld [vmem:[#allocation7 + $0xa0] sm:$0xff] }
  0xd3   :  { %1590 = vmatpush.bf16.msrb.mxu1 %v2248_v6  ;;  %v1358_v29 = vpop.f32.mrf.mxu1 }
  0xd4   :  { %1615 = vmatpush.bf16.msra.mxu2 %v2520_v4 }
  0xd5   :  { %1602 = vmatpush.bf16.msra.mxu3 %v2392_v3 }
  0xd6   :  { %1591 = vmatmul.bf16.vlgmr.msrb.gmra.mxu1 %v3282_v51  ;;  %1629 = vmatpush.bf16.msra.mxu0 %v2632_v21  ;;  %v3103_v51 = vld [vmem:[#allocation7 + $0x70] sm:$0xff]  ;;  %v3106_v21 = vld [vmem:[#allocation7 + $0x88] sm:$0xff] }
  0xd7   :  { %1642 = vmatpush.bf16.msra.mxu1 %v2760_v14 }
  0xd8   :  { %1616 = vmatpush.bf16.msra.mxu2 %v2504_v19 }
  0xd9   :  { %1603 = vmatpush.bf16.msra.mxu3 %v2376_v18  ;;  %1630 = vmatmul.bf16.vlgmr.msra.gmra.mxu0 %v3300_v35  ;;  %v3101_v35 = vld [vmem:[#allocation7 + $0x60] sm:$0xff] }
  0xda   :  { %v1347_v38 = vpop.f32.mrf.mxu0 }
  0xdb   :  { %1929 = vmatpush.bf16.msrb.mxu1 %v3104_v24  ;;  %1617 = vmatmul.bf16.vlgmr.msra.gmra.mxu2 %v3298_v30  ;;  %v1384_v36 = vpop.f32.mrf.mxu3  ;;  %v1360_v39 = vpop.f32.mrf.mxu1 }
  0xdc   :  { %1604 = vmatmul.bf16.vlgmr.msra.gmra.mxu3 %v3286_v57  ;;  %v1333_v57 = vadd.f32 %v3328_v37, %v1320_v28  ;;  %v3099_v37 = vld [vmem:[#allocation7 + $0x50] sm:$0xff]  ;;  %v1385_v58 = vadd.f32 %v1384_v36, %v293_v54  ;;  %1942 = vmatpush.bf16.msrb.mxu2 %v3112_v1  ;;  %v295_v54 = vperm.slane %v3330_v5, 3 }
  0xdd   :  { %1916 = vmatpush.bf16.msrb.mxu3 %v3096_v20  ;;  %v3119_v28 = vld [vmem:[#allocation7 + $0xf0] sm:$0xff] }
  0xde   :  { %v1346_v30 = vadd.f32 %v1345_v27, %v1333_v57  ;;  %v1397_v40 = vpop.f32.mrf.mxu2  ;;  %v3118_v57 = vld [vmem:[#allocation7 + $0xe8] sm:$0xff] }
  0xdf   :  { %1930 = vmatpush.bf16.msrb.mxu1 %v3103_v51  ;;  %v1398_v62 = vadd.f32 %v1397_v40, %v1385_v58 }
  0xe0   :  { %v1359_v41 = vadd.f32 %v1358_v29, %v1346_v30  ;;  %1943 = vmatpush.bf16.msrb.mxu2 %v3111_v2  ;;  %v294_v29 = vperm.slane %v3330_v5, 2  ;;  %v3117_v30 = vld [vmem:[#allocation7 + $0xe0] sm:$0xff] }
  0xe1   :  { %1917 = vmatpush.bf16.msrb.mxu3 %v3095_v7 }
  0xe2   :  { %v1372_v44 = vadd.f32 %v1371_v23, %v1359_v41 }
  0xe3   :  { %1931 = vmatpush.bf16.msrb.mxu1 %v3102_v34  ;;  %v1386_v46 = vpop.f32.mrf.mxu3 }
  0xe4   :  { %v1648_v49 = vmax.f32 %v1372_v44, 0.0  ;;  %1944 = vmatpush.bf16.msrb.mxu2 %v3110_v9 }
  0xe5   :  { %1918 = vmatpush.bf16.msrb.mxu3 %v3094_v16  ;;  %v3120_v16 = vld [vmem:[#allocation7 + $0xf8] sm:$0xff] }
  0xe6   :  { %2764 = vmatmul.msk.bf16.vlgmr.msra.gmra.mxu1 %vm1280_vm0, %v3294_v45  ;;  %v1399_v48 = vpop.f32.mrf.mxu2  ;;  %v1652_v45 = vpack.c.bf16 %v1648_v49, %v1648_v49  ;;  %1955 = vmatpush.bf16.msrb.mxu0 %v3120_v16 }
  0xe7   :  { %1932 = vmatpush.bf16.msrb.mxu1 %v3101_v35  ;;  %v3116_v35 = vld [vmem:[#allocation7 + $0xd8] sm:$0xff] }
  0xe8   :  { %1945 = vmatpush.bf16.msrb.mxu2 %v3109_v11 }
  0xe9   :  { %1919 = vmatpush.bf16.msrb.mxu3 %v3093_v33 }
  0xea   :  { %1956 = vmatpush.bf16.msrb.mxu0 %v3119_v28 }
  0xeb   :  { %1933 = vmatpush.bf16.msrb.mxu1 %v3100_v42  ;;  %v3115_v42 = vld [vmem:[#allocation7 + $0xd0] sm:$0xff] }
  0xec   :  { %1946 = vmatpush.bf16.msrb.mxu2 %v3108_v55 }
  0xed   :  { %1920 = vmatpush.bf16.msrb.mxu3 %v3092_v25 }
  0xee   :  { %1957 = vmatpush.bf16.msrb.mxu0 %v3118_v57 }
  0xef   :  { %1934 = vmatpush.bf16.msrb.mxu1 %v3099_v37 }
  0xf0   :  { %1947 = vmatpush.bf16.msrb.mxu2 %v3107_v17 }
  0xf1   :  { %1921 = vmatpush.bf16.msrb.mxu3 %v3091_v31 }
  0xf2   :  { %v1410_v53 = vpop.f32.mrf.mxu0  ;;  %1958 = vmatpush.bf16.msrb.mxu0 %v3117_v30 }
  0xf3   :  { %1935 = vmatpush.bf16.msrb.mxu1 %v3098_v50  ;;  %v1423_v56 = vpop.f32.mrf.mxu1  ;;  %v1411_v0 = vadd.f32 %v1410_v53, %v1398_v62 }
  0xf4   :  { %1948 = vmatpush.bf16.msrb.mxu2 %v3106_v21 }
  0xf5   :  { %1922 = vmatpush.bf16.msrb.mxu3 %v3090_v43  ;;  %v1424_v4 = vadd.f32 %v1423_v56, %v1411_v0 }
  0xf6   :  { %1959 = vmatpush.bf16.msrb.mxu0 %v3116_v35 }
  0xf7   :  { %1936 = vmatpush.bf16.msrb.mxu1 %v3097_v52 }
  0xf8   :  { %1949 = vmatpush.bf16.msrb.mxu2 %v3105_v26 }
  0xf9   :  { %1923 = vmatpush.bf16.msrb.mxu3 %v3089_v47  ;;  %v3114_v47 = vld [vmem:[#allocation7 + $0xc8] sm:$0xff] }
  0xfa   :  { %v1412_v60 = vpop.f32.mrf.mxu0  ;;  %1960 = vmatpush.bf16.msrb.mxu0 %v3115_v42 }
  0xfb   :  { %v1436_v59 = vpop.f32.mrf.mxu3  ;;  %v1425_v63 = vpop.f32.mrf.mxu1 }
  0xfc   :  { %1924 = vmatmul.bf16.vlgmr.msrb.gmra.mxu3 %v1652_v45  ;;  %v1437_v8 = vadd.f32 %v1436_v59, %v1424_v4  ;;  %v3113_v45 = vld [vmem:[#allocation7 + $0xc0] sm:$0xff] }
  0xfe   :  { %v1449_v61 = vpop.f32.mrf.mxu2  ;;  %1961 = vmatpush.bf16.msrb.mxu0 %v3114_v47 }
  0xff   :  { %v1450_v10 = vadd.f32 %v1449_v61, %v1437_v8 }
 0x102   :  { %1962 = vmatpush.bf16.msrb.mxu0 %v3113_v45 }
 0x103   :  { %v1438_v3 = vpop.f32.mrf.mxu3 }
 0x106   :  { %v1451_v6 = vpop.f32.mrf.mxu2 }
 0x10b   :  { %v1462_v12 = vpop.f32.mrf.mxu3 }
 0x10c   :  { %v1463_v13 = vadd.f32 %v1462_v12, %v1450_v10 }
 0x10e   :  { %v1649_v14 = vmax.f32 %v1463_v13, 0.0 }
 0x110   :  { %v1653_v15 = vpack.c.bf16 %v1649_v14, %v1649_v14 }
 0x112   :  { %1937 = vmatmul.bf16.vlgmr.msrb.gmra.mxu1 %v1653_v15  ;;  %v1501_v19 = vpop.f32.mrf.mxu0  ;;  %v3129_v15 = vld [vmem:[%s3356_s4] ss:$0 sm:$0xff] }
 0x113   :  { %v1464_v18 = vpop.f32.mrf.mxu3  ;;  %v1475_v20 = vpop.f32.mrf.mxu1 }
 0x114   :  { %v1476_v33 = vadd.f32 %v1475_v20, %v294_v29 }
 0x11a   :  { %v1503_v23 = vpop.f32.mrf.mxu0 }
 0x11b   :  { %v1477_v7 = vpop.f32.mrf.mxu1 }
 0x11e   :  { %v1514_v24 = vpop.f32.mrf.mxu2 }
 0x11f   :  { %v1488_v22 = vpop.f32.mrf.mxu3 }
 0x120   :  { %v1489_v25 = vadd.f32 %v1488_v22, %v1476_v33 }
 0x122   :  { %v1553_v51 = vpop.f32.mrf.mxu0  ;;  %v1502_v38 = vadd.f32 %v1501_v19, %v1489_v25 }
 0x124   :  { %v1515_v39 = vadd.f32 %v1514_v24, %v1502_v38 }
 0x126   :  { %v1516_v32 = vpop.f32.mrf.mxu2 }
 0x127   :  { %v1490_v27 = vpop.f32.mrf.mxu3 }
 0x12a   :  { %v1555_v34 = vpop.f32.mrf.mxu0 }
 0x133   :  { %v1527_v36 = vpop.f32.mrf.mxu1 }
 0x134   :  { %v1528_v40 = vadd.f32 %v1527_v36, %v1515_v39 }
 0x136   :  { %v1579_v31 = vpop.f32.mrf.mxu0 }
 0x13b   :  { %v1529_v41 = vpop.f32.mrf.mxu1 }
 0x13e   :  { %v1566_v44 = vpop.f32.mrf.mxu2  ;;  %v1581_v49 = vpop.f32.mrf.mxu0 }
 0x13f   :  { %v1540_v43 = vpop.f32.mrf.mxu3  ;;  %v1567_v56 = vadd.f32 %v1566_v44, %v295_v54 }
 0x140   :  { %v1541_v37 = vadd.f32 %v1540_v43, %v1528_v40 }
 0x141   :  { %v1580_v59 = vadd.f32 %v1579_v31, %v1567_v56 }
 0x142   :  { %v1554_v46 = vadd.f32 %v1553_v51, %v1541_v37 }
 0x144   :  { %v1650_v48 = vmax.f32 %v1554_v46, 0.0 }
 0x146   :  { %v1654_v50 = vpack.c.bf16 %v1650_v48, %v1650_v48  ;;  %v1568_v53 = vpop.f32.mrf.mxu2 }
 0x147   :  { %v1542_v52 = vpop.f32.mrf.mxu3 }
 0x148   :  { %1950 = vmatmul.bf16.vlgmr.msrb.gmra.mxu2 %v1654_v50 }
 0x153   :  { %v1592_v58 = vpop.f32.mrf.mxu1 }
 0x154   :  { %v1593_v61 = vadd.f32 %v1592_v58, %v1580_v59 }
 0x156   :  { %v1631_v60 = vpop.f32.mrf.mxu0 }
 0x15b   :  { %v1594_v62 = vpop.f32.mrf.mxu1 }
 0x15e   :  { %v1618_v1 = vpop.f32.mrf.mxu2  ;;  %v1633_v3 = vpop.f32.mrf.mxu0 }
 0x15f   :  { %v1605_v63 = vpop.f32.mrf.mxu3 }
 0x160   :  { %v1606_v0 = vadd.f32 %v1605_v63, %v1593_v61 }
 0x162   :  { %v1619_v2 = vadd.f32 %v1618_v1, %v1606_v0 }
 0x163   :  { %v1644_v6 = vpop.f32.mrf.mxu1 }
 0x164   :  { %v1632_v4 = vadd.f32 %v1631_v60, %v1619_v2 }
 0x166   :  { %v1645_v8 = vadd.f32 %v1644_v6, %v1632_v4  ;;  %v1620_v10 = vpop.f32.mrf.mxu2 }
 0x167   :  { %v1607_v9 = vpop.f32.mrf.mxu3 }
 0x168   :  { %v1651_v11 = vmax.f32 %v1645_v8, 0.0 }
 0x16a   :  { %v1655_v12 = vpack.c.bf16 %v1651_v11, %v1651_v11 }
 0x16b   :  { %v1646_v5 = vpop.f32.mrf.mxu1 }
 0x16c   :  { %1963 = vmatmul.bf16.vlgmr.msrb.gmra.mxu0 %v1655_v12 }
 0x17f   :  { %v1925_v13 = vpop.f32.mrf.mxu3 }
 0x180   :  { %v1926_v55 = vadd.f32 %v3129_v15, %v1925_v13 }
 0x187   :  { %v1927_v14 = vpop.f32.mrf.mxu3 }
 0x18f   :  { %v1938_v17 = vpop.f32.mrf.mxu1 }
 0x190   :  { %v1939_v18 = vadd.f32 %v1938_v17, %v1926_v55 }
 0x197   :  { %v1940_v19 = vpop.f32.mrf.mxu1 }
 0x1cb   :  { %v1951_v20 = vpop.f32.mrf.mxu2 }
 0x1cc   :  { %v1952_v22 = vadd.f32 %v1951_v20, %v1939_v18 }
 0x1d3   :  { %v1953_v21 = vpop.f32.mrf.mxu2 }
 0x1e9   :  { %v1964_v23 = vpop.f32.mrf.mxu0 }
 0x1ea   :  { %v1965_v24 = vadd.f32 %v1964_v23, %v1952_v22 }
 0x1ec   :  { %v1968_v7 = vpack.c.bf16 %v1965_v24, %v1965_v24 }
 0x1ee   :  { %1969 = vst [vmem:[%s3357_s5] sm:$0xf] %v1968_v7 }
 0x1f1   :  { %v1966_v26 = vpop.f32.mrf.mxu0 }
 0x1f2   :  { %1974 = vsyncpa [#allocation3], 1 }
 0x1f3   :  { %1975 = vsyncpa [#allocation5], 1 }
 0x1f4   :  { %1976 = vsyncpa [#allocation8], 1 }

</bundles_post_ra>
